<compile_context>
chip_gen: v7x
topology: tpu7x:2x2x1
jax: 0.10.0
libtpu: 0.0.40
codegen_flags: <defaults>
</compile_context>

<pallas_src>
import functools

import jax
import jax.numpy as jnp
from jax import lax
from jax.experimental import pallas as pl
from jax.experimental.pallas import tpu as pltpu

# ---- hyperparameters (LANGUAGE_MODELING_PARAMETERS analogue, small shapes) ----
NTOKEN = 64
NINP = 32          # emsize
NHID = 32          # must equal NINP because tie_weights=True
NLAYERS = 2
SEQ_LEN = 8
BATCH = 2

assert NINP == NHID, "tie_weights=True requires nhid == emsize"

# TPU-friendly padded sizes.
B_PAD = 8            # sublane width: unmasked (8,*) vreg accesses
NTOK_PAD = 128       # lane width: lane-dense decoder output stores + one-hot width
NEG_INF = -1e30      # bias padding -> padded tokens get ~0 probability


# ---------------------------------------------------------------------------
# Fused Pallas kernel
# ---------------------------------------------------------------------------
def fused_rnn_kernel(tok_ref, enc_w_ref, w_cat_ref, b_ref, h0_ref, c0_ref,
                     dec_wt_ref, dec_b_ref,
                     logp_ref, hT_ref, cT_ref):
    """Embedding + NLAYERS-layer LSTM (wavefront) + tied decoder + log_softmax.

    tok_ref:     (T*Bp, 1) int32      token ids (batch padded to Bp)
    enc_w_ref:   (NTOK_PAD, NINP)     embedding table, zero-padded rows
    w_cat_ref:   (NLAYERS, 2H, 4H)    [W_ih^T ; W_hh^T], gate cols [i, f, o, g]
    b_ref:       (NLAYERS, 1, 4H)     b_ih + b_hh, same gate order
    h0_ref,c0_ref: (NLAYERS, Bp, H)   initial state
    dec_wt_ref:  (H, NTOK_PAD)        tied decoder weight^T, zero-padded columns
    dec_b_ref:   (1, NTOK_PAD)        decoder bias, padded columns = -1e30
    logp_ref:    (T*Bp, NTOK_PAD)     log-probabilities (padded)
    hT_ref,cT_ref: (NLAYERS, Bp, H)   final state
    """
    nlayers, Bp, H = h0_ref.shape
    TB = tok_ref.shape[0]
    T = TB // Bp
    ntok_pad = enc_w_ref.shape[0]
    G = 3 * H                                            # contiguous sigmoid span (i, f, o)

    # ---- embedding gather as a one-hot MXU matmul (exact in f32) ----
    tok = tok_ref[...]                                   # (T*Bp, 1) int32
    col = lax.broadcasted_iota(jnp.int32, (TB, ntok_pad), 1)
    onehot = (col == tok).astype(jnp.float32)            # (T*Bp, NTOK_PAD)
    x0 = jnp.dot(onehot, enc_w_ref[...],
                 preferred_element_type=jnp.float32)     # (T*Bp, NINP)

    # Weights / bias hoisted once (reused across all unrolled steps).
    w = [w_cat_ref[l] for l in range(nlayers)]           # each (2H, 4H)
    b = [b_ref[l] for l in range(nlayers)]               # each (1, 4H)
    h = [h0_ref[l].astype(jnp.float32) for l in range(nlayers)]
    c = [c0_ref[l].astype(jnp.float32) for l in range(nlayers)]

    def cell(x_in, h_prev, c_prev, layer):
        # One fused MXU push: [x_t, h_{t-1}] @ [W_ih^T ; W_hh^T] + b
        xc = jnp.concatenate([x_in, h_prev], axis=1)     # (Bp, 2H)
        gates = jnp.dot(xc, w[layer],
                        preferred_element_type=jnp.float32) + b[layer]   # (Bp, 4H)
        ifo = jax.nn.sigmoid(gates[:, :G])               # one sigmoid over 3H lanes
        g = jnp.tanh(gates[:, G:])                       # one tanh over H lanes
        c_new = ifo[:, H:2 * H] * c_prev + ifo[:, 0:H] * g
        h_new = ifo[:, 2 * H:3 * H] * jnp.tanh(c_new)
        return h_new, c_new

    # Wavefront over (time, layer): step s runs layer l at time t = s - l.
    # Layers are visited high->low inside a step so `pending[l-1]` still holds
    # layer l-1's output from the PREVIOUS step (time t).
    pending = [None] * nlayers        # pending[l] = h output of layer l awaiting layer l+1
    top = [None] * T                  # top-layer outputs, kept as live values
    for s in range(T + nlayers - 1):
        for l in reversed(range(nlayers)):
            t = s - l
            if 0 <= t < T:
                x_in = x0[t * Bp:(t + 1) * Bp, :] if l == 0 else pending[l - 1]
                h[l], c[l] = cell(x_in, h[l], c[l], l)
                if l < nlayers - 1:
                    pending[l] = h[l]
                else:
                    top[t] = h[l]

    for l in range(nlayers):
        hT_ref[l] = h[l].astype(hT_ref.dtype)
        cT_ref[l] = c[l].astype(cT_ref.dtype)

    # ---- tied decoder + numerically-stable log_softmax (lane-dense 128 cols) ----
    flat = jnp.concatenate(top, axis=0)                  # (T*Bp, H) — vreg stacking
    logits = (jnp.dot(flat, dec_wt_ref[...], preferred_element_type=jnp.float32)
              + dec_b_ref[...])                          # (T*Bp, NTOK_PAD)
    m = jnp.max(logits, axis=-1, keepdims=True)
    shifted = logits - m
    lse = jnp.log(jnp.sum(jnp.exp(shifted), axis=-1, keepdims=True))
    logp_ref[...] = (shifted - lse).astype(logp_ref.dtype)


# ---------------------------------------------------------------------------
# Wrappers (glue)
# ---------------------------------------------------------------------------
_VMEM_SPEC = pl.BlockSpec(memory_space=pltpu.MemorySpace.VMEM)


def fused_rnn_forward(tok_pad, enc_w_pad, w_cat, b, h0_pad, c0_pad,
                      dec_wt_pad, dec_b_pad):
    T = tok_pad.shape[0] // B_PAD
    return pl.pallas_call(
        fused_rnn_kernel,
        out_shape=(jax.ShapeDtypeStruct((T * B_PAD, NTOK_PAD), jnp.float32),
                   jax.ShapeDtypeStruct((NLAYERS, B_PAD, NHID), jnp.float32),
                   jax.ShapeDtypeStruct((NLAYERS, B_PAD, NHID), jnp.float32)),
        in_specs=[_VMEM_SPEC] * 8,
        out_specs=(_VMEM_SPEC, _VMEM_SPEC, _VMEM_SPEC),
    )(tok_pad, enc_w_pad, w_cat, b, h0_pad, c0_pad, dec_wt_pad, dec_b_pad)


def _gate_permutation(h):
    # PyTorch LSTM gate order along 4H is [i, f, g, o]; reorder to [i, f, o, g]
    # so the three sigmoid gates are lane-contiguous.
    return jnp.concatenate([jnp.arange(0, h), jnp.arange(h, 2 * h),
                            jnp.arange(3 * h, 4 * h), jnp.arange(2 * h, 3 * h)])


def init_params(key):
    """Deterministic parameter init mirroring the PyTorch module's shapes."""
    keys = jax.random.split(key, 2 + 4 * NLAYERS)
    params = {}
    # Embedding / tied decoder weight: uniform(-0.1, 0.1), shape (ntoken, ninp)
    params["encoder_weight"] = jax.random.uniform(
        keys[0], (NTOKEN, NINP), jnp.float32, -0.1, 0.1)
    kb = 1.0 / jnp.sqrt(jnp.float32(NHID))
    params["decoder_bias"] = jax.random.uniform(
        keys[1], (NTOKEN,), jnp.float32, -kb, kb)

    perm = _gate_permutation(NHID)
    klstm = 1.0 / jnp.sqrt(jnp.float32(NHID))
    wcat_l, b_l = [], []
    for layer in range(NLAYERS):
        din = NINP if layer == 0 else NHID
        k0, k1, k2, k3 = keys[2 + 4 * layer: 2 + 4 * (layer + 1)]
        w_ih = jax.random.uniform(k0, (4 * NHID, din), jnp.float32, -klstm, klstm)
        w_hh = jax.random.uniform(k1, (4 * NHID, NHID), jnp.float32, -klstm, klstm)
        b_ih = jax.random.uniform(k2, (4 * NHID,), jnp.float32, -klstm, klstm)
        b_hh = jax.random.uniform(k3, (4 * NHID,), jnp.float32, -klstm, klstm)
        # Raw (PyTorch-layout) copies kept for the pure-JAX reference check.
        params[f"raw_w_ih_{layer}"] = w_ih
        params[f"raw_w_hh_{layer}"] = w_hh
        params[f"raw_b_{layer}"] = b_ih + b_hh
        # Kernel layout: transposed, gate-column-permuted, input+recurrent stacked.
        w_ih_t = jnp.transpose(w_ih)[:, perm]                       # (din, 4H)
        w_hh_t = jnp.transpose(w_hh)[:, perm]                       # (H, 4H)
        wcat_l.append(jnp.concatenate([w_ih_t, w_hh_t], axis=0))    # (din+H, 4H)
        b_l.append((b_ih + b_hh)[perm].reshape(1, 4 * NHID))        # (1, 4H)
    params["w_cat"] = jnp.stack(wcat_l)   # (NLAYERS, 2H, 4H)  (NINP == NHID)
    params["b"] = jnp.stack(b_l)          # (NLAYERS, 1, 4H)
    return params


@functools.partial(jax.jit, static_argnames=())
def rnn_model_forward(params, tokens, h0, c0):
    """tokens: (T, B) int32; h0, c0: (nlayers, B, nhid)."""
    T, B = tokens.shape
    # Pad batch to the sublane width; extra rows are discarded afterwards.
    tok_pad = jnp.pad(tokens, ((0, 0), (0, B_PAD - B)))
    tok_pad = tok_pad.reshape(T * B_PAD, 1).astype(jnp.int32)
    h0_pad = jnp.pad(h0, ((0, 0), (0, B_PAD - B), (0, 0)))
    c0_pad = jnp.pad(c0, ((0, 0), (0, B_PAD - B), (0, 0)))

    # Embedding table padded to 128 rows (one-hot width); dropout = identity (eval).
    enc_w_pad = jnp.pad(params["encoder_weight"],
                        ((0, NTOK_PAD - NTOKEN), (0, 0)))           # (NTOK_PAD, ninp)
    # tie_weights=True: decoder.weight == encoder.weight; pad lane-dense.
    dec_wt_pad = jnp.pad(jnp.transpose(params["encoder_weight"]),
                         ((0, 0), (0, NTOK_PAD - NTOKEN)))          # (nhid, NTOK_PAD)
    dec_b_pad = jnp.full((1, NTOK_PAD), NEG_INF, jnp.float32)
    dec_b_pad = dec_b_pad.at[0, :NTOKEN].set(params["decoder_bias"])

    logp_pad, hT_pad, cT_pad = fused_rnn_forward(
        tok_pad, enc_w_pad, params["w_cat"], params["b"],
        h0_pad, c0_pad, dec_wt_pad, dec_b_pad)

    logp = logp_pad.reshape(T, B_PAD, NTOK_PAD)[:, :B, :NTOKEN].reshape(T * B, NTOKEN)
    hT = hT_pad[:, :B, :]
    cT = cT_pad[:, :B, :]
    return logp, (hT, cT)


# ---------------------------------------------------------------------------
# Pure-JAX reference (PyTorch LSTM math with unpermuted weights)
# ---------------------------------------------------------------------------
def reference_forward(params, tokens, h0, c0):
    T, B = tokens.shape
    H = NHID
    prec = lax.Precision.HIGHEST
    x = params["encoder_weight"][tokens]                      # (T, B, ninp)
    h_out, c_out = [], []
    for layer in range(NLAYERS):
        w_ih = params[f"raw_w_ih_{layer}"]                    # (4H, Din)
        w_hh = params[f"raw_w_hh_{layer}"]                    # (4H, H)
        b = params[f"raw_b_{layer}"]                          # (4H,)
        h = h0[layer]
        c = c0[layer]
        ys = []
        for t in range(T):
            gates = (jnp.dot(x[t], w_ih.T, precision=prec)
                     + jnp.dot(h, w_hh.T, precision=prec) + b)
            i = jax.nn.sigmoid(gates[:, 0 * H:1 * H])
            f = jax.nn.sigmoid(gates[:, 1 * H:2 * H])
            g = jnp.tanh(gates[:, 2 * H:3 * H])
            o = jax.nn.sigmoid(gates[:, 3 * H:4 * H])
            c = f * c + i * g
            h = o * jnp.tanh(c)
            ys.append(h)
        x = jnp.stack(ys, axis=0)
        h_out.append(h)
        c_out.append(c)
    logits = (jnp.dot(x.reshape(T * B, H), params["encoder_weight"].T, precision=prec)
              + params["decoder_bias"])
    logp = jax.nn.log_softmax(logits, axis=-1)
    return logp, (jnp.stack(h_out, axis=0), jnp.stack(c_out, axis=0))


if __name__ == "__main__":
    key = jax.random.PRNGKey(0)
    k_param, k_tok = jax.random.split(key)
    params = init_params(k_param)

    tokens = jax.random.randint(k_tok, (SEQ_LEN, BATCH), 0, NTOKEN, dtype=jnp.int32)
    h0 = jnp.zeros((NLAYERS, BATCH, NHID), jnp.float32)
    c0 = jnp.zeros((NLAYERS, BATCH, NHID), jnp.float32)

    logp, (hT, cT) = rnn_model_forward(params, tokens, h0, c0)
    logp = jax.block_until_ready(logp)
    hT = jax.block_until_ready(hT)
    cT = jax.block_until_ready(cT)

    assert logp.shape == (SEQ_LEN * BATCH, NTOKEN)
    assert hT.shape == (NLAYERS, BATCH, NHID)
    assert cT.shape == (NLAYERS, BATCH, NHID)
    assert bool(jnp.all(jnp.isfinite(logp)))
    # log_softmax rows must (approximately) sum to 1 in prob space
    row_sums = jnp.exp(logp).sum(axis=-1)
    assert bool(jnp.all(jnp.abs(row_sums - 1.0) < 1e-3))

    # Numerical check against the pure-JAX reference.
    ref_logp, (ref_hT, ref_cT) = reference_forward(params, tokens, h0, c0)
    assert bool(jnp.max(jnp.abs(logp - ref_logp)) < 5e-3), "logp mismatch vs reference"
    assert bool(jnp.max(jnp.abs(hT - ref_hT)) < 5e-3), "hT mismatch vs reference"
    assert bool(jnp.max(jnp.abs(cT - ref_cT)) < 5e-3), "cT mismatch vs reference"

    print("KERNEL_OK")
</pallas_src>

<mosaic_0001>
module attributes {stable_mosaic.version = 11 : i64} {
  func.func @fused_rnn_kernel(%arg0: memref<64x1xi32, #tpu.memory_space<vmem>>, %arg1: memref<128x32xf32, #tpu.memory_space<vmem>>, %arg2: memref<2x64x128xf32, #tpu.memory_space<vmem>>, %arg3: memref<2x1x128xf32, #tpu.memory_space<vmem>>, %arg4: memref<2x8x32xf32, #tpu.memory_space<vmem>>, %arg5: memref<2x8x32xf32, #tpu.memory_space<vmem>>, %arg6: memref<32x128xf32, #tpu.memory_space<vmem>>, %arg7: memref<1x128xf32, #tpu.memory_space<vmem>>, %arg8: memref<64x128xf32, #tpu.memory_space<vmem>>, %arg9: memref<2x8x32xf32, #tpu.memory_space<vmem>>, %arg10: memref<2x8x32xf32, #tpu.memory_space<vmem>>) attributes {dimension_semantics = [], scalar_prefetch = 0 : i64, scratch_operands = 0 : i64, tpu.core_type = #tpu.core_type<tc>} {
    %c0 = arith.constant 0 : index
    %c0_0 = arith.constant 0 : index
    %0 = vector.load %arg0[%c0, %c0_0] : memref<64x1xi32, #tpu.memory_space<vmem>>, vector<64x1xi32>
    %1 = tpu.iota {dimensions = array<i32: 1>} : vector<64x128xi32>
    %2 = vector.broadcast %0 : vector<64x1xi32> to vector<64x128xi32>
    %3 = arith.cmpi eq, %1, %2 : vector<64x128xi32>
    %4 = arith.extui %3 : vector<64x128xi1> to vector<64x128xi32>
    %5 = arith.sitofp %4 : vector<64x128xi32> to vector<64x128xf32>
    %c0_1 = arith.constant 0 : index
    %c0_2 = arith.constant 0 : index
    %6 = vector.load %arg1[%c0_1, %c0_2] : memref<128x32xf32, #tpu.memory_space<vmem>>, vector<128x32xf32>
    %cst = arith.constant dense<0.000000e+00> : vector<64x32xf32>
    %7 = tpu.matmul %5, %6, %cst {dimension_numbers = #tpu.dot_dimension_numbers<[1], [0], [0], [1], [0, 0, 1, 1], [], []>} : vector<64x128xf32>, vector<128x32xf32>, vector<64x32xf32> -> vector<64x32xf32>
    %c0_3 = arith.constant 0 : index
    %c0_4 = arith.constant 0 : index
    %c0_5 = arith.constant 0 : index
    %8 = vector.load %arg2[%c0_3, %c0_4, %c0_5] : memref<2x64x128xf32, #tpu.memory_space<vmem>>, vector<1x64x128xf32>
    %9 = vector.shape_cast %8 : vector<1x64x128xf32> to vector<64x128xf32>
    %c1 = arith.constant 1 : index
    %c0_6 = arith.constant 0 : index
    %c0_7 = arith.constant 0 : index
    %10 = vector.load %arg2[%c1, %c0_6, %c0_7] : memref<2x64x128xf32, #tpu.memory_space<vmem>>, vector<1x64x128xf32>
    %11 = vector.shape_cast %10 : vector<1x64x128xf32> to vector<64x128xf32>
    %c0_8 = arith.constant 0 : index
    %c0_9 = arith.constant 0 : index
    %c0_10 = arith.constant 0 : index
    %12 = vector.load %arg3[%c0_8, %c0_9, %c0_10] : memref<2x1x128xf32, #tpu.memory_space<vmem>>, vector<1x1x128xf32>
    %13 = vector.shape_cast %12 : vector<1x1x128xf32> to vector<1x128xf32>
    %c1_11 = arith.constant 1 : index
    %c0_12 = arith.constant 0 : index
    %c0_13 = arith.constant 0 : index
    %14 = vector.load %arg3[%c1_11, %c0_12, %c0_13] : memref<2x1x128xf32, #tpu.memory_space<vmem>>, vector<1x1x128xf32>
    %15 = vector.shape_cast %14 : vector<1x1x128xf32> to vector<1x128xf32>
    %c0_14 = arith.constant 0 : index
    %c0_15 = arith.constant 0 : index
    %c0_16 = arith.constant 0 : index
    %16 = vector.load %arg4[%c0_14, %c0_15, %c0_16] : memref<2x8x32xf32, #tpu.memory_space<vmem>>, vector<1x8x32xf32>
    %17 = vector.shape_cast %16 : vector<1x8x32xf32> to vector<8x32xf32>
    %c1_17 = arith.constant 1 : index
    %c0_18 = arith.constant 0 : index
    %c0_19 = arith.constant 0 : index
    %18 = vector.load %arg4[%c1_17, %c0_18, %c0_19] : memref<2x8x32xf32, #tpu.memory_space<vmem>>, vector<1x8x32xf32>
    %19 = vector.shape_cast %18 : vector<1x8x32xf32> to vector<8x32xf32>
    %c0_20 = arith.constant 0 : index
    %c0_21 = arith.constant 0 : index
    %c0_22 = arith.constant 0 : index
    %20 = vector.load %arg5[%c0_20, %c0_21, %c0_22] : memref<2x8x32xf32, #tpu.memory_space<vmem>>, vector<1x8x32xf32>
    %21 = vector.shape_cast %20 : vector<1x8x32xf32> to vector<8x32xf32>
    %c1_23 = arith.constant 1 : index
    %c0_24 = arith.constant 0 : index
    %c0_25 = arith.constant 0 : index
    %22 = vector.load %arg5[%c1_23, %c0_24, %c0_25] : memref<2x8x32xf32, #tpu.memory_space<vmem>>, vector<1x8x32xf32>
    %23 = vector.shape_cast %22 : vector<1x8x32xf32> to vector<8x32xf32>
    %24 = vector.extract_strided_slice %7 {offsets = [0, 0], sizes = [8, 32], strides = [1, 1]} : vector<64x32xf32> to vector<8x32xf32>
    %25 = tpu.concatenate %24, %17 in 1 : vector<8x32xf32>, vector<8x32xf32> -> vector<8x64xf32>
    %cst_26 = arith.constant dense<0.000000e+00> : vector<8x128xf32>
    %26 = tpu.matmul %25, %9, %cst_26 {dimension_numbers = #tpu.dot_dimension_numbers<[1], [0], [0], [1], [0, 0, 1, 1], [], []>} : vector<8x64xf32>, vector<64x128xf32>, vector<8x128xf32> -> vector<8x128xf32>
    %27 = vector.broadcast %13 : vector<1x128xf32> to vector<8x128xf32>
    %28 = arith.addf %26, %27 : vector<8x128xf32>
    %29 = vector.extract_strided_slice %28 {offsets = [0, 0], sizes = [8, 96], strides = [1, 1]} : vector<8x128xf32> to vector<8x96xf32>
    %30 = arith.negf %29 : vector<8x96xf32>
    %31 = math.exp %30 : vector<8x96xf32>
    %cst_27 = arith.constant 1.000000e+00 : f32
    %32 = vector.broadcast %cst_27 : f32 to vector<8x96xf32>
    %33 = arith.addf %32, %31 : vector<8x96xf32>
    %34 = arith.divf %32, %33 : vector<8x96xf32>
    %35 = vector.extract_strided_slice %28 {offsets = [0, 96], sizes = [8, 32], strides = [1, 1]} : vector<8x128xf32> to vector<8x32xf32>
    %36 = math.tanh %35 : vector<8x32xf32>
    %37 = vector.extract_strided_slice %34 {offsets = [0, 32], sizes = [8, 32], strides = [1, 1]} : vector<8x96xf32> to vector<8x32xf32>
    %38 = arith.mulf %37, %21 : vector<8x32xf32>
    %39 = vector.extract_strided_slice %34 {offsets = [0, 0], sizes = [8, 32], strides = [1, 1]} : vector<8x96xf32> to vector<8x32xf32>
    %40 = arith.mulf %39, %36 : vector<8x32xf32>
    %41 = arith.addf %38, %40 : vector<8x32xf32>
    %42 = vector.extract_strided_slice %34 {offsets = [0, 64], sizes = [8, 32], strides = [1, 1]} : vector<8x96xf32> to vector<8x32xf32>
    %43 = math.tanh %41 : vector<8x32xf32>
    %44 = arith.mulf %42, %43 : vector<8x32xf32>
    %45 = tpu.concatenate %44, %19 in 1 : vector<8x32xf32>, vector<8x32xf32> -> vector<8x64xf32>
    %cst_28 = arith.constant dense<0.000000e+00> : vector<8x128xf32>
    %46 = tpu.matmul %45, %11, %cst_28 {dimension_numbers = #tpu.dot_dimension_numbers<[1], [0], [0], [1], [0, 0, 1, 1], [], []>} : vector<8x64xf32>, vector<64x128xf32>, vector<8x128xf32> -> vector<8x128xf32>
    %47 = vector.broadcast %15 : vector<1x128xf32> to vector<8x128xf32>
    %48 = arith.addf %46, %47 : vector<8x128xf32>
    %49 = vector.extract_strided_slice %48 {offsets = [0, 0], sizes = [8, 96], strides = [1, 1]} : vector<8x128xf32> to vector<8x96xf32>
    %50 = arith.negf %49 : vector<8x96xf32>
    %51 = math.exp %50 : vector<8x96xf32>
    %cst_29 = arith.constant 1.000000e+00 : f32
    %52 = vector.broadcast %cst_29 : f32 to vector<8x96xf32>
    %53 = arith.addf %52, %51 : vector<8x96xf32>
    %54 = arith.divf %52, %53 : vector<8x96xf32>
    %55 = vector.extract_strided_slice %48 {offsets = [0, 96], sizes = [8, 32], strides = [1, 1]} : vector<8x128xf32> to vector<8x32xf32>
    %56 = math.tanh %55 : vector<8x32xf32>
    %57 = vector.extract_strided_slice %54 {offsets = [0, 32], sizes = [8, 32], strides = [1, 1]} : vector<8x96xf32> to vector<8x32xf32>
    %58 = arith.mulf %57, %23 : vector<8x32xf32>
    %59 = vector.extract_strided_slice %54 {offsets = [0, 0], sizes = [8, 32], strides = [1, 1]} : vector<8x96xf32> to vector<8x32xf32>
    %60 = arith.mulf %59, %56 : vector<8x32xf32>
    %61 = arith.addf %58, %60 : vector<8x32xf32>
    %62 = vector.extract_strided_slice %54 {offsets = [0, 64], sizes = [8, 32], strides = [1, 1]} : vector<8x96xf32> to vector<8x32xf32>
    %63 = math.tanh %61 : vector<8x32xf32>
    %64 = arith.mulf %62, %63 : vector<8x32xf32>
    %65 = vector.extract_strided_slice %7 {offsets = [8, 0], sizes = [8, 32], strides = [1, 1]} : vector<64x32xf32> to vector<8x32xf32>
    %66 = tpu.concatenate %65, %44 in 1 : vector<8x32xf32>, vector<8x32xf32> -> vector<8x64xf32>
    %cst_30 = arith.constant dense<0.000000e+00> : vector<8x128xf32>
    %67 = tpu.matmul %66, %9, %cst_30 {dimension_numbers = #tpu.dot_dimension_numbers<[1], [0], [0], [1], [0, 0, 1, 1], [], []>} : vector<8x64xf32>, vector<64x128xf32>, vector<8x128xf32> -> vector<8x128xf32>
    %68 = vector.broadcast %13 : vector<1x128xf32> to vector<8x128xf32>
    %69 = arith.addf %67, %68 : vector<8x128xf32>
    %70 = vector.extract_strided_slice %69 {offsets = [0, 0], sizes = [8, 96], strides = [1, 1]} : vector<8x128xf32> to vector<8x96xf32>
    %71 = arith.negf %70 : vector<8x96xf32>
    %72 = math.exp %71 : vector<8x96xf32>
    %cst_31 = arith.constant 1.000000e+00 : f32
    %73 = vector.broadcast %cst_31 : f32 to vector<8x96xf32>
    %74 = arith.addf %73, %72 : vector<8x96xf32>
    %75 = arith.divf %73, %74 : vector<8x96xf32>
    %76 = vector.extract_strided_slice %69 {offsets = [0, 96], sizes = [8, 32], strides = [1, 1]} : vector<8x128xf32> to vector<8x32xf32>
    %77 = math.tanh %76 : vector<8x32xf32>
    %78 = vector.extract_strided_slice %75 {offsets = [0, 32], sizes = [8, 32], strides = [1, 1]} : vector<8x96xf32> to vector<8x32xf32>
    %79 = arith.mulf %78, %41 : vector<8x32xf32>
    %80 = vector.extract_strided_slice %75 {offsets = [0, 0], sizes = [8, 32], strides = [1, 1]} : vector<8x96xf32> to vector<8x32xf32>
    %81 = arith.mulf %80, %77 : vector<8x32xf32>
    %82 = arith.addf %79, %81 : vector<8x32xf32>
    %83 = vector.extract_strided_slice %75 {offsets = [0, 64], sizes = [8, 32], strides = [1, 1]} : vector<8x96xf32> to vector<8x32xf32>
    %84 = math.tanh %82 : vector<8x32xf32>
    %85 = arith.mulf %83, %84 : vector<8x32xf32>
    %86 = tpu.concatenate %85, %64 in 1 : vector<8x32xf32>, vector<8x32xf32> -> vector<8x64xf32>
    %cst_32 = arith.constant dense<0.000000e+00> : vector<8x128xf32>
    %87 = tpu.matmul %86, %11, %cst_32 {dimension_numbers = #tpu.dot_dimension_numbers<[1], [0], [0], [1], [0, 0, 1, 1], [], []>} : vector<8x64xf32>, vector<64x128xf32>, vector<8x128xf32> -> vector<8x128xf32>
    %88 = vector.broadcast %15 : vector<1x128xf32> to vector<8x128xf32>
    %89 = arith.addf %87, %88 : vector<8x128xf32>
    %90 = vector.extract_strided_slice %89 {offsets = [0, 0], sizes = [8, 96], strides = [1, 1]} : vector<8x128xf32> to vector<8x96xf32>
    %91 = arith.negf %90 : vector<8x96xf32>
    %92 = math.exp %91 : vector<8x96xf32>
    %cst_33 = arith.constant 1.000000e+00 : f32
    %93 = vector.broadcast %cst_33 : f32 to vector<8x96xf32>
    %94 = arith.addf %93, %92 : vector<8x96xf32>
    %95 = arith.divf %93, %94 : vector<8x96xf32>
    %96 = vector.extract_strided_slice %89 {offsets = [0, 96], sizes = [8, 32], strides = [1, 1]} : vector<8x128xf32> to vector<8x32xf32>
    %97 = math.tanh %96 : vector<8x32xf32>
    %98 = vector.extract_strided_slice %95 {offsets = [0, 32], sizes = [8, 32], strides = [1, 1]} : vector<8x96xf32> to vector<8x32xf32>
    %99 = arith.mulf %98, %61 : vector<8x32xf32>
    %100 = vector.extract_strided_slice %95 {offsets = [0, 0], sizes = [8, 32], strides = [1, 1]} : vector<8x96xf32> to vector<8x32xf32>
    %101 = arith.mulf %100, %97 : vector<8x32xf32>
    %102 = arith.addf %99, %101 : vector<8x32xf32>
    %103 = vector.extract_strided_slice %95 {offsets = [0, 64], sizes = [8, 32], strides = [1, 1]} : vector<8x96xf32> to vector<8x32xf32>
    %104 = math.tanh %102 : vector<8x32xf32>
    %105 = arith.mulf %103, %104 : vector<8x32xf32>
    %106 = vector.extract_strided_slice %7 {offsets = [16, 0], sizes = [8, 32], strides = [1, 1]} : vector<64x32xf32> to vector<8x32xf32>
    %107 = tpu.concatenate %106, %85 in 1 : vector<8x32xf32>, vector<8x32xf32> -> vector<8x64xf32>
    %cst_34 = arith.constant dense<0.000000e+00> : vector<8x128xf32>
    %108 = tpu.matmul %107, %9, %cst_34 {dimension_numbers = #tpu.dot_dimension_numbers<[1], [0], [0], [1], [0, 0, 1, 1], [], []>} : vector<8x64xf32>, vector<64x128xf32>, vector<8x128xf32> -> vector<8x128xf32>
    %109 = vector.broadcast %13 : vector<1x128xf32> to vector<8x128xf32>
    %110 = arith.addf %108, %109 : vector<8x128xf32>
    %111 = vector.extract_strided_slice %110 {offsets = [0, 0], sizes = [8, 96], strides = [1, 1]} : vector<8x128xf32> to vector<8x96xf32>
    %112 = arith.negf %111 : vector<8x96xf32>
    %113 = math.exp %112 : vector<8x96xf32>
    %cst_35 = arith.constant 1.000000e+00 : f32
    %114 = vector.broadcast %cst_35 : f32 to vector<8x96xf32>
    %115 = arith.addf %114, %113 : vector<8x96xf32>
    %116 = arith.divf %114, %115 : vector<8x96xf32>
    %117 = vector.extract_strided_slice %110 {offsets = [0, 96], sizes = [8, 32], strides = [1, 1]} : vector<8x128xf32> to vector<8x32xf32>
    %118 = math.tanh %117 : vector<8x32xf32>
    %119 = vector.extract_strided_slice %116 {offsets = [0, 32], sizes = [8, 32], strides = [1, 1]} : vector<8x96xf32> to vector<8x32xf32>
    %120 = arith.mulf %119, %82 : vector<8x32xf32>
    %121 = vector.extract_strided_slice %116 {offsets = [0, 0], sizes = [8, 32], strides = [1, 1]} : vector<8x96xf32> to vector<8x32xf32>
    %122 = arith.mulf %121, %118 : vector<8x32xf32>
    %123 = arith.addf %120, %122 : vector<8x32xf32>
    %124 = vector.extract_strided_slice %116 {offsets = [0, 64], sizes = [8, 32], strides = [1, 1]} : vector<8x96xf32> to vector<8x32xf32>
    %125 = math.tanh %123 : vector<8x32xf32>
    %126 = arith.mulf %124, %125 : vector<8x32xf32>
    %127 = tpu.concatenate %126, %105 in 1 : vector<8x32xf32>, vector<8x32xf32> -> vector<8x64xf32>
    %cst_36 = arith.constant dense<0.000000e+00> : vector<8x128xf32>
    %128 = tpu.matmul %127, %11, %cst_36 {dimension_numbers = #tpu.dot_dimension_numbers<[1], [0], [0], [1], [0, 0, 1, 1], [], []>} : vector<8x64xf32>, vector<64x128xf32>, vector<8x128xf32> -> vector<8x128xf32>
    %129 = vector.broadcast %15 : vector<1x128xf32> to vector<8x128xf32>
    %130 = arith.addf %128, %129 : vector<8x128xf32>
    %131 = vector.extract_strided_slice %130 {offsets = [0, 0], sizes = [8, 96], strides = [1, 1]} : vector<8x128xf32> to vector<8x96xf32>
    %132 = arith.negf %131 : vector<8x96xf32>
    %133 = math.exp %132 : vector<8x96xf32>
    %cst_37 = arith.constant 1.000000e+00 : f32
    %134 = vector.broadcast %cst_37 : f32 to vector<8x96xf32>
    %135 = arith.addf %134, %133 : vector<8x96xf32>
    %136 = arith.divf %134, %135 : vector<8x96xf32>
    %137 = vector.extract_strided_slice %130 {offsets = [0, 96], sizes = [8, 32], strides = [1, 1]} : vector<8x128xf32> to vector<8x32xf32>
    %138 = math.tanh %137 : vector<8x32xf32>
    %139 = vector.extract_strided_slice %136 {offsets = [0, 32], sizes = [8, 32], strides = [1, 1]} : vector<8x96xf32> to vector<8x32xf32>
    %140 = arith.mulf %139, %102 : vector<8x32xf32>
    %141 = vector.extract_strided_slice %136 {offsets = [0, 0], sizes = [8, 32], strides = [1, 1]} : vector<8x96xf32> to vector<8x32xf32>
    %142 = arith.mulf %141, %138 : vector<8x32xf32>
    %143 = arith.addf %140, %142 : vector<8x32xf32>
    %144 = vector.extract_strided_slice %136 {offsets = [0, 64], sizes = [8, 32], strides = [1, 1]} : vector<8x96xf32> to vector<8x32xf32>
    %145 = math.tanh %143 : vector<8x32xf32>
    %146 = arith.mulf %144, %145 : vector<8x32xf32>
    %147 = vector.extract_strided_slice %7 {offsets = [24, 0], sizes = [8, 32], strides = [1, 1]} : vector<64x32xf32> to vector<8x32xf32>
    %148 = tpu.concatenate %147, %126 in 1 : vector<8x32xf32>, vector<8x32xf32> -> vector<8x64xf32>
    %cst_38 = arith.constant dense<0.000000e+00> : vector<8x128xf32>
    %149 = tpu.matmul %148, %9, %cst_38 {dimension_numbers = #tpu.dot_dimension_numbers<[1], [0], [0], [1], [0, 0, 1, 1], [], []>} : vector<8x64xf32>, vector<64x128xf32>, vector<8x128xf32> -> vector<8x128xf32>
    %150 = vector.broadcast %13 : vector<1x128xf32> to vector<8x128xf32>
    %151 = arith.addf %149, %150 : vector<8x128xf32>
    %152 = vector.extract_strided_slice %151 {offsets = [0, 0], sizes = [8, 96], strides = [1, 1]} : vector<8x128xf32> to vector<8x96xf32>
    %153 = arith.negf %152 : vector<8x96xf32>
    %154 = math.exp %153 : vector<8x96xf32>
    %cst_39 = arith.constant 1.000000e+00 : f32
    %155 = vector.broadcast %cst_39 : f32 to vector<8x96xf32>
    %156 = arith.addf %155, %154 : vector<8x96xf32>
    %157 = arith.divf %155, %156 : vector<8x96xf32>
    %158 = vector.extract_strided_slice %151 {offsets = [0, 96], sizes = [8, 32], strides = [1, 1]} : vector<8x128xf32> to vector<8x32xf32>
    %159 = math.tanh %158 : vector<8x32xf32>
    %160 = vector.extract_strided_slice %157 {offsets = [0, 32], sizes = [8, 32], strides = [1, 1]} : vector<8x96xf32> to vector<8x32xf32>
    %161 = arith.mulf %160, %123 : vector<8x32xf32>
    %162 = vector.extract_strided_slice %157 {offsets = [0, 0], sizes = [8, 32], strides = [1, 1]} : vector<8x96xf32> to vector<8x32xf32>
    %163 = arith.mulf %162, %159 : vector<8x32xf32>
    %164 = arith.addf %161, %163 : vector<8x32xf32>
    %165 = vector.extract_strided_slice %157 {offsets = [0, 64], sizes = [8, 32], strides = [1, 1]} : vector<8x96xf32> to vector<8x32xf32>
    %166 = math.tanh %164 : vector<8x32xf32>
    %167 = arith.mulf %165, %166 : vector<8x32xf32>
    %168 = tpu.concatenate %167, %146 in 1 : vector<8x32xf32>, vector<8x32xf32> -> vector<8x64xf32>
    %cst_40 = arith.constant dense<0.000000e+00> : vector<8x128xf32>
    %169 = tpu.matmul %168, %11, %cst_40 {dimension_numbers = #tpu.dot_dimension_numbers<[1], [0], [0], [1], [0, 0, 1, 1], [], []>} : vector<8x64xf32>, vector<64x128xf32>, vector<8x128xf32> -> vector<8x128xf32>
    %170 = vector.broadcast %15 : vector<1x128xf32> to vector<8x128xf32>
    %171 = arith.addf %169, %170 : vector<8x128xf32>
    %172 = vector.extract_strided_slice %171 {offsets = [0, 0], sizes = [8, 96], strides = [1, 1]} : vector<8x128xf32> to vector<8x96xf32>
    %173 = arith.negf %172 : vector<8x96xf32>
    %174 = math.exp %173 : vector<8x96xf32>
    %cst_41 = arith.constant 1.000000e+00 : f32
    %175 = vector.broadcast %cst_41 : f32 to vector<8x96xf32>
    %176 = arith.addf %175, %174 : vector<8x96xf32>
    %177 = arith.divf %175, %176 : vector<8x96xf32>
    %178 = vector.extract_strided_slice %171 {offsets = [0, 96], sizes = [8, 32], strides = [1, 1]} : vector<8x128xf32> to vector<8x32xf32>
    %179 = math.tanh %178 : vector<8x32xf32>
    %180 = vector.extract_strided_slice %177 {offsets = [0, 32], sizes = [8, 32], strides = [1, 1]} : vector<8x96xf32> to vector<8x32xf32>
    %181 = arith.mulf %180, %143 : vector<8x32xf32>
    %182 = vector.extract_strided_slice %177 {offsets = [0, 0], sizes = [8, 32], strides = [1, 1]} : vector<8x96xf32> to vector<8x32xf32>
    %183 = arith.mulf %182, %179 : vector<8x32xf32>
    %184 = arith.addf %181, %183 : vector<8x32xf32>
    %185 = vector.extract_strided_slice %177 {offsets = [0, 64], sizes = [8, 32], strides = [1, 1]} : vector<8x96xf32> to vector<8x32xf32>
    %186 = math.tanh %184 : vector<8x32xf32>
    %187 = arith.mulf %185, %186 : vector<8x32xf32>
    %188 = vector.extract_strided_slice %7 {offsets = [32, 0], sizes = [8, 32], strides = [1, 1]} : vector<64x32xf32> to vector<8x32xf32>
    %189 = tpu.concatenate %188, %167 in 1 : vector<8x32xf32>, vector<8x32xf32> -> vector<8x64xf32>
    %cst_42 = arith.constant dense<0.000000e+00> : vector<8x128xf32>
    %190 = tpu.matmul %189, %9, %cst_42 {dimension_numbers = #tpu.dot_dimension_numbers<[1], [0], [0], [1], [0, 0, 1, 1], [], []>} : vector<8x64xf32>, vector<64x128xf32>, vector<8x128xf32> -> vector<8x128xf32>
    %191 = vector.broadcast %13 : vector<1x128xf32> to vector<8x128xf32>
    %192 = arith.addf %190, %191 : vector<8x128xf32>
    %193 = vector.extract_strided_slice %192 {offsets = [0, 0], sizes = [8, 96], strides = [1, 1]} : vector<8x128xf32> to vector<8x96xf32>
    %194 = arith.negf %193 : vector<8x96xf32>
    %195 = math.exp %194 : vector<8x96xf32>
    %cst_43 = arith.constant 1.000000e+00 : f32
    %196 = vector.broadcast %cst_43 : f32 to vector<8x96xf32>
    %197 = arith.addf %196, %195 : vector<8x96xf32>
    %198 = arith.divf %196, %197 : vector<8x96xf32>
    %199 = vector.extract_strided_slice %192 {offsets = [0, 96], sizes = [8, 32], strides = [1, 1]} : vector<8x128xf32> to vector<8x32xf32>
    %200 = math.tanh %199 : vector<8x32xf32>
    %201 = vector.extract_strided_slice %198 {offsets = [0, 32], sizes = [8, 32], strides = [1, 1]} : vector<8x96xf32> to vector<8x32xf32>
    %202 = arith.mulf %201, %164 : vector<8x32xf32>
    %203 = vector.extract_strided_slice %198 {offsets = [0, 0], sizes = [8, 32], strides = [1, 1]} : vector<8x96xf32> to vector<8x32xf32>
    %204 = arith.mulf %203, %200 : vector<8x32xf32>
    %205 = arith.addf %202, %204 : vector<8x32xf32>
    %206 = vector.extract_strided_slice %198 {offsets = [0, 64], sizes = [8, 32], strides = [1, 1]} : vector<8x96xf32> to vector<8x32xf32>
    %207 = math.tanh %205 : vector<8x32xf32>
    %208 = arith.mulf %206, %207 : vector<8x32xf32>
    %209 = tpu.concatenate %208, %187 in 1 : vector<8x32xf32>, vector<8x32xf32> -> vector<8x64xf32>
    %cst_44 = arith.constant dense<0.000000e+00> : vector<8x128xf32>
    %210 = tpu.matmul %209, %11, %cst_44 {dimension_numbers = #tpu.dot_dimension_numbers<[1], [0], [0], [1], [0, 0, 1, 1], [], []>} : vector<8x64xf32>, vector<64x128xf32>, vector<8x128xf32> -> vector<8x128xf32>
    %211 = vector.broadcast %15 : vector<1x128xf32> to vector<8x128xf32>
    %212 = arith.addf %210, %211 : vector<8x128xf32>
    %213 = vector.extract_strided_slice %212 {offsets = [0, 0], sizes = [8, 96], strides = [1, 1]} : vector<8x128xf32> to vector<8x96xf32>
    %214 = arith.negf %213 : vector<8x96xf32>
    %215 = math.exp %214 : vector<8x96xf32>
    %cst_45 = arith.constant 1.000000e+00 : f32
    %216 = vector.broadcast %cst_45 : f32 to vector<8x96xf32>
    %217 = arith.addf %216, %215 : vector<8x96xf32>
    %218 = arith.divf %216, %217 : vector<8x96xf32>
    %219 = vector.extract_strided_slice %212 {offsets = [0, 96], sizes = [8, 32], strides = [1, 1]} : vector<8x128xf32> to vector<8x32xf32>
    %220 = math.tanh %219 : vector<8x32xf32>
    %221 = vector.extract_strided_slice %218 {offsets = [0, 32], sizes = [8, 32], strides = [1, 1]} : vector<8x96xf32> to vector<8x32xf32>
    %222 = arith.mulf %221, %184 : vector<8x32xf32>
    %223 = vector.extract_strided_slice %218 {offsets = [0, 0], sizes = [8, 32], strides = [1, 1]} : vector<8x96xf32> to vector<8x32xf32>
    %224 = arith.mulf %223, %220 : vector<8x32xf32>
    %225 = arith.addf %222, %224 : vector<8x32xf32>
    %226 = vector.extract_strided_slice %218 {offsets = [0, 64], sizes = [8, 32], strides = [1, 1]} : vector<8x96xf32> to vector<8x32xf32>
    %227 = math.tanh %225 : vector<8x32xf32>
    %228 = arith.mulf %226, %227 : vector<8x32xf32>
    %229 = vector.extract_strided_slice %7 {offsets = [40, 0], sizes = [8, 32], strides = [1, 1]} : vector<64x32xf32> to vector<8x32xf32>
    %230 = tpu.concatenate %229, %208 in 1 : vector<8x32xf32>, vector<8x32xf32> -> vector<8x64xf32>
    %cst_46 = arith.constant dense<0.000000e+00> : vector<8x128xf32>
    %231 = tpu.matmul %230, %9, %cst_46 {dimension_numbers = #tpu.dot_dimension_numbers<[1], [0], [0], [1], [0, 0, 1, 1], [], []>} : vector<8x64xf32>, vector<64x128xf32>, vector<8x128xf32> -> vector<8x128xf32>
    %232 = vector.broadcast %13 : vector<1x128xf32> to vector<8x128xf32>
    %233 = arith.addf %231, %232 : vector<8x128xf32>
    %234 = vector.extract_strided_slice %233 {offsets = [0, 0], sizes = [8, 96], strides = [1, 1]} : vector<8x128xf32> to vector<8x96xf32>
    %235 = arith.negf %234 : vector<8x96xf32>
    %236 = math.exp %235 : vector<8x96xf32>
    %cst_47 = arith.constant 1.000000e+00 : f32
    %237 = vector.broadcast %cst_47 : f32 to vector<8x96xf32>
    %238 = arith.addf %237, %236 : vector<8x96xf32>
    %239 = arith.divf %237, %238 : vector<8x96xf32>
    %240 = vector.extract_strided_slice %233 {offsets = [0, 96], sizes = [8, 32], strides = [1, 1]} : vector<8x128xf32> to vector<8x32xf32>
    %241 = math.tanh %240 : vector<8x32xf32>
    %242 = vector.extract_strided_slice %239 {offsets = [0, 32], sizes = [8, 32], strides = [1, 1]} : vector<8x96xf32> to vector<8x32xf32>
    %243 = arith.mulf %242, %205 : vector<8x32xf32>
    %244 = vector.extract_strided_slice %239 {offsets = [0, 0], sizes = [8, 32], strides = [1, 1]} : vector<8x96xf32> to vector<8x32xf32>
    %245 = arith.mulf %244, %241 : vector<8x32xf32>
    %246 = arith.addf %243, %245 : vector<8x32xf32>
    %247 = vector.extract_strided_slice %239 {offsets = [0, 64], sizes = [8, 32], strides = [1, 1]} : vector<8x96xf32> to vector<8x32xf32>
    %248 = math.tanh %246 : vector<8x32xf32>
    %249 = arith.mulf %247, %248 : vector<8x32xf32>
    %250 = tpu.concatenate %249, %228 in 1 : vector<8x32xf32>, vector<8x32xf32> -> vector<8x64xf32>
    %cst_48 = arith.constant dense<0.000000e+00> : vector<8x128xf32>
    %251 = tpu.matmul %250, %11, %cst_48 {dimension_numbers = #tpu.dot_dimension_numbers<[1], [0], [0], [1], [0, 0, 1, 1], [], []>} : vector<8x64xf32>, vector<64x128xf32>, vector<8x128xf32> -> vector<8x128xf32>
    %252 = vector.broadcast %15 : vector<1x128xf32> to vector<8x128xf32>
    %253 = arith.addf %251, %252 : vector<8x128xf32>
    %254 = vector.extract_strided_slice %253 {offsets = [0, 0], sizes = [8, 96], strides = [1, 1]} : vector<8x128xf32> to vector<8x96xf32>
    %255 = arith.negf %254 : vector<8x96xf32>
    %256 = math.exp %255 : vector<8x96xf32>
    %cst_49 = arith.constant 1.000000e+00 : f32
    %257 = vector.broadcast %cst_49 : f32 to vector<8x96xf32>
    %258 = arith.addf %257, %256 : vector<8x96xf32>
    %259 = arith.divf %257, %258 : vector<8x96xf32>
    %260 = vector.extract_strided_slice %253 {offsets = [0, 96], sizes = [8, 32], strides = [1, 1]} : vector<8x128xf32> to vector<8x32xf32>
    %261 = math.tanh %260 : vector<8x32xf32>
    %262 = vector.extract_strided_slice %259 {offsets = [0, 32], sizes = [8, 32], strides = [1, 1]} : vector<8x96xf32> to vector<8x32xf32>
    %263 = arith.mulf %262, %225 : vector<8x32xf32>
    %264 = vector.extract_strided_slice %259 {offsets = [0, 0], sizes = [8, 32], strides = [1, 1]} : vector<8x96xf32> to vector<8x32xf32>
    %265 = arith.mulf %264, %261 : vector<8x32xf32>
    %266 = arith.addf %263, %265 : vector<8x32xf32>
    %267 = vector.extract_strided_slice %259 {offsets = [0, 64], sizes = [8, 32], strides = [1, 1]} : vector<8x96xf32> to vector<8x32xf32>
    %268 = math.tanh %266 : vector<8x32xf32>
    %269 = arith.mulf %267, %268 : vector<8x32xf32>
    %270 = vector.extract_strided_slice %7 {offsets = [48, 0], sizes = [8, 32], strides = [1, 1]} : vector<64x32xf32> to vector<8x32xf32>
    %271 = tpu.concatenate %270, %249 in 1 : vector<8x32xf32>, vector<8x32xf32> -> vector<8x64xf32>
    %cst_50 = arith.constant dense<0.000000e+00> : vector<8x128xf32>
    %272 = tpu.matmul %271, %9, %cst_50 {dimension_numbers = #tpu.dot_dimension_numbers<[1], [0], [0], [1], [0, 0, 1, 1], [], []>} : vector<8x64xf32>, vector<64x128xf32>, vector<8x128xf32> -> vector<8x128xf32>
    %273 = vector.broadcast %13 : vector<1x128xf32> to vector<8x128xf32>
    %274 = arith.addf %272, %273 : vector<8x128xf32>
    %275 = vector.extract_strided_slice %274 {offsets = [0, 0], sizes = [8, 96], strides = [1, 1]} : vector<8x128xf32> to vector<8x96xf32>
    %276 = arith.negf %275 : vector<8x96xf32>
    %277 = math.exp %276 : vector<8x96xf32>
    %cst_51 = arith.constant 1.000000e+00 : f32
    %278 = vector.broadcast %cst_51 : f32 to vector<8x96xf32>
    %279 = arith.addf %278, %277 : vector<8x96xf32>
    %280 = arith.divf %278, %279 : vector<8x96xf32>
    %281 = vector.extract_strided_slice %274 {offsets = [0, 96], sizes = [8, 32], strides = [1, 1]} : vector<8x128xf32> to vector<8x32xf32>
    %282 = math.tanh %281 : vector<8x32xf32>
    %283 = vector.extract_strided_slice %280 {offsets = [0, 32], sizes = [8, 32], strides = [1, 1]} : vector<8x96xf32> to vector<8x32xf32>
    %284 = arith.mulf %283, %246 : vector<8x32xf32>
    %285 = vector.extract_strided_slice %280 {offsets = [0, 0], sizes = [8, 32], strides = [1, 1]} : vector<8x96xf32> to vector<8x32xf32>
    %286 = arith.mulf %285, %282 : vector<8x32xf32>
    %287 = arith.addf %284, %286 : vector<8x32xf32>
    %288 = vector.extract_strided_slice %280 {offsets = [0, 64], sizes = [8, 32], strides = [1, 1]} : vector<8x96xf32> to vector<8x32xf32>
    %289 = math.tanh %287 : vector<8x32xf32>
    %290 = arith.mulf %288, %289 : vector<8x32xf32>
    %291 = tpu.concatenate %290, %269 in 1 : vector<8x32xf32>, vector<8x32xf32> -> vector<8x64xf32>
    %cst_52 = arith.constant dense<0.000000e+00> : vector<8x128xf32>
    %292 = tpu.matmul %291, %11, %cst_52 {dimension_numbers = #tpu.dot_dimension_numbers<[1], [0], [0], [1], [0, 0, 1, 1], [], []>} : vector<8x64xf32>, vector<64x128xf32>, vector<8x128xf32> -> vector<8x128xf32>
    %293 = vector.broadcast %15 : vector<1x128xf32> to vector<8x128xf32>
    %294 = arith.addf %292, %293 : vector<8x128xf32>
    %295 = vector.extract_strided_slice %294 {offsets = [0, 0], sizes = [8, 96], strides = [1, 1]} : vector<8x128xf32> to vector<8x96xf32>
    %296 = arith.negf %295 : vector<8x96xf32>
    %297 = math.exp %296 : vector<8x96xf32>
    %cst_53 = arith.constant 1.000000e+00 : f32
    %298 = vector.broadcast %cst_53 : f32 to vector<8x96xf32>
    %299 = arith.addf %298, %297 : vector<8x96xf32>
    %300 = arith.divf %298, %299 : vector<8x96xf32>
    %301 = vector.extract_strided_slice %294 {offsets = [0, 96], sizes = [8, 32], strides = [1, 1]} : vector<8x128xf32> to vector<8x32xf32>
    %302 = math.tanh %301 : vector<8x32xf32>
    %303 = vector.extract_strided_slice %300 {offsets = [0, 32], sizes = [8, 32], strides = [1, 1]} : vector<8x96xf32> to vector<8x32xf32>
    %304 = arith.mulf %303, %266 : vector<8x32xf32>
    %305 = vector.extract_strided_slice %300 {offsets = [0, 0], sizes = [8, 32], strides = [1, 1]} : vector<8x96xf32> to vector<8x32xf32>
    %306 = arith.mulf %305, %302 : vector<8x32xf32>
    %307 = arith.addf %304, %306 : vector<8x32xf32>
    %308 = vector.extract_strided_slice %300 {offsets = [0, 64], sizes = [8, 32], strides = [1, 1]} : vector<8x96xf32> to vector<8x32xf32>
    %309 = math.tanh %307 : vector<8x32xf32>
    %310 = arith.mulf %308, %309 : vector<8x32xf32>
    %311 = vector.extract_strided_slice %7 {offsets = [56, 0], sizes = [8, 32], strides = [1, 1]} : vector<64x32xf32> to vector<8x32xf32>
    %312 = tpu.concatenate %311, %290 in 1 : vector<8x32xf32>, vector<8x32xf32> -> vector<8x64xf32>
    %cst_54 = arith.constant dense<0.000000e+00> : vector<8x128xf32>
    %313 = tpu.matmul %312, %9, %cst_54 {dimension_numbers = #tpu.dot_dimension_numbers<[1], [0], [0], [1], [0, 0, 1, 1], [], []>} : vector<8x64xf32>, vector<64x128xf32>, vector<8x128xf32> -> vector<8x128xf32>
    %314 = vector.broadcast %13 : vector<1x128xf32> to vector<8x128xf32>
    %315 = arith.addf %313, %314 : vector<8x128xf32>
    %316 = vector.extract_strided_slice %315 {offsets = [0, 0], sizes = [8, 96], strides = [1, 1]} : vector<8x128xf32> to vector<8x96xf32>
    %317 = arith.negf %316 : vector<8x96xf32>
    %318 = math.exp %317 : vector<8x96xf32>
    %cst_55 = arith.constant 1.000000e+00 : f32
    %319 = vector.broadcast %cst_55 : f32 to vector<8x96xf32>
    %320 = arith.addf %319, %318 : vector<8x96xf32>
    %321 = arith.divf %319, %320 : vector<8x96xf32>
    %322 = vector.extract_strided_slice %315 {offsets = [0, 96], sizes = [8, 32], strides = [1, 1]} : vector<8x128xf32> to vector<8x32xf32>
    %323 = math.tanh %322 : vector<8x32xf32>
    %324 = vector.extract_strided_slice %321 {offsets = [0, 32], sizes = [8, 32], strides = [1, 1]} : vector<8x96xf32> to vector<8x32xf32>
    %325 = arith.mulf %324, %287 : vector<8x32xf32>
    %326 = vector.extract_strided_slice %321 {offsets = [0, 0], sizes = [8, 32], strides = [1, 1]} : vector<8x96xf32> to vector<8x32xf32>
    %327 = arith.mulf %326, %323 : vector<8x32xf32>
    %328 = arith.addf %325, %327 : vector<8x32xf32>
    %329 = vector.extract_strided_slice %321 {offsets = [0, 64], sizes = [8, 32], strides = [1, 1]} : vector<8x96xf32> to vector<8x32xf32>
    %330 = math.tanh %328 : vector<8x32xf32>
    %331 = arith.mulf %329, %330 : vector<8x32xf32>
    %332 = tpu.concatenate %331, %310 in 1 : vector<8x32xf32>, vector<8x32xf32> -> vector<8x64xf32>
    %cst_56 = arith.constant dense<0.000000e+00> : vector<8x128xf32>
    %333 = tpu.matmul %332, %11, %cst_56 {dimension_numbers = #tpu.dot_dimension_numbers<[1], [0], [0], [1], [0, 0, 1, 1], [], []>} : vector<8x64xf32>, vector<64x128xf32>, vector<8x128xf32> -> vector<8x128xf32>
    %334 = vector.broadcast %15 : vector<1x128xf32> to vector<8x128xf32>
    %335 = arith.addf %333, %334 : vector<8x128xf32>
    %336 = vector.extract_strided_slice %335 {offsets = [0, 0], sizes = [8, 96], strides = [1, 1]} : vector<8x128xf32> to vector<8x96xf32>
    %337 = arith.negf %336 : vector<8x96xf32>
    %338 = math.exp %337 : vector<8x96xf32>
    %cst_57 = arith.constant 1.000000e+00 : f32
    %339 = vector.broadcast %cst_57 : f32 to vector<8x96xf32>
    %340 = arith.addf %339, %338 : vector<8x96xf32>
    %341 = arith.divf %339, %340 : vector<8x96xf32>
    %342 = vector.extract_strided_slice %335 {offsets = [0, 96], sizes = [8, 32], strides = [1, 1]} : vector<8x128xf32> to vector<8x32xf32>
    %343 = math.tanh %342 : vector<8x32xf32>
    %344 = vector.extract_strided_slice %341 {offsets = [0, 32], sizes = [8, 32], strides = [1, 1]} : vector<8x96xf32> to vector<8x32xf32>
    %345 = arith.mulf %344, %307 : vector<8x32xf32>
    %346 = vector.extract_strided_slice %341 {offsets = [0, 0], sizes = [8, 32], strides = [1, 1]} : vector<8x96xf32> to vector<8x32xf32>
    %347 = arith.mulf %346, %343 : vector<8x32xf32>
    %348 = arith.addf %345, %347 : vector<8x32xf32>
    %349 = vector.extract_strided_slice %341 {offsets = [0, 64], sizes = [8, 32], strides = [1, 1]} : vector<8x96xf32> to vector<8x32xf32>
    %350 = math.tanh %348 : vector<8x32xf32>
    %351 = arith.mulf %349, %350 : vector<8x32xf32>
    %c0_58 = arith.constant 0 : index
    %c0_59 = arith.constant 0 : index
    %c0_60 = arith.constant 0 : index
    %352 = vector.load %arg9[%c0_58, %c0_59, %c0_60] : memref<2x8x32xf32, #tpu.memory_space<vmem>>, vector<1x8x32xf32>
    %353 = vector.shape_cast %352 : vector<1x8x32xf32> to vector<8x32xf32>
    %354 = vector.shape_cast %331 : vector<8x32xf32> to vector<1x8x32xf32>
    tpu.vector_store %arg9[%c0_58, %c0_59, %c0_60], %354 {strides = array<i32>} : memref<2x8x32xf32, #tpu.memory_space<vmem>>, vector<1x8x32xf32>,
    %c0_61 = arith.constant 0 : index
    %c0_62 = arith.constant 0 : index
    %c0_63 = arith.constant 0 : index
    %355 = vector.load %arg10[%c0_61, %c0_62, %c0_63] : memref<2x8x32xf32, #tpu.memory_space<vmem>>, vector<1x8x32xf32>
    %356 = vector.shape_cast %355 : vector<1x8x32xf32> to vector<8x32xf32>
    %357 = vector.shape_cast %328 : vector<8x32xf32> to vector<1x8x32xf32>
    tpu.vector_store %arg10[%c0_61, %c0_62, %c0_63], %357 {strides = array<i32>} : memref<2x8x32xf32, #tpu.memory_space<vmem>>, vector<1x8x32xf32>,
    %c1_64 = arith.constant 1 : index
    %c0_65 = arith.constant 0 : index
    %c0_66 = arith.constant 0 : index
    %358 = vector.load %arg9[%c1_64, %c0_65, %c0_66] : memref<2x8x32xf32, #tpu.memory_space<vmem>>, vector<1x8x32xf32>
    %359 = vector.shape_cast %358 : vector<1x8x32xf32> to vector<8x32xf32>
    %360 = vector.shape_cast %351 : vector<8x32xf32> to vector<1x8x32xf32>
    tpu.vector_store %arg9[%c1_64, %c0_65, %c0_66], %360 {strides = array<i32>} : memref<2x8x32xf32, #tpu.memory_space<vmem>>, vector<1x8x32xf32>,
    %c1_67 = arith.constant 1 : index
    %c0_68 = arith.constant 0 : index
    %c0_69 = arith.constant 0 : index
    %361 = vector.load %arg10[%c1_67, %c0_68, %c0_69] : memref<2x8x32xf32, #tpu.memory_space<vmem>>, vector<1x8x32xf32>
    %362 = vector.shape_cast %361 : vector<1x8x32xf32> to vector<8x32xf32>
    %363 = vector.shape_cast %348 : vector<8x32xf32> to vector<1x8x32xf32>
    tpu.vector_store %arg10[%c1_67, %c0_68, %c0_69], %363 {strides = array<i32>} : memref<2x8x32xf32, #tpu.memory_space<vmem>>, vector<1x8x32xf32>,
    %364 = tpu.concatenate %64, %105, %146, %187, %228, %269, %310, %351 in 0 : vector<8x32xf32>, vector<8x32xf32>, vector<8x32xf32>, vector<8x32xf32>, vector<8x32xf32>, vector<8x32xf32>, vector<8x32xf32>, vector<8x32xf32> -> vector<64x32xf32>
    %c0_70 = arith.constant 0 : index
    %c0_71 = arith.constant 0 : index
    %365 = vector.load %arg6[%c0_70, %c0_71] : memref<32x128xf32, #tpu.memory_space<vmem>>, vector<32x128xf32>
    %cst_72 = arith.constant dense<0.000000e+00> : vector<64x128xf32>
    %366 = tpu.matmul %364, %365, %cst_72 {dimension_numbers = #tpu.dot_dimension_numbers<[1], [0], [0], [1], [0, 0, 1, 1], [], []>} : vector<64x32xf32>, vector<32x128xf32>, vector<64x128xf32> -> vector<64x128xf32>
    %c0_73 = arith.constant 0 : index
    %c0_74 = arith.constant 0 : index
    %367 = vector.load %arg7[%c0_73, %c0_74] : memref<1x128xf32, #tpu.memory_space<vmem>>, vector<1x128xf32>
    %368 = vector.broadcast %367 : vector<1x128xf32> to vector<64x128xf32>
    %369 = arith.addf %366, %368 : vector<64x128xf32>
    %cst_75 = arith.constant dense<0xFF800000> : vector<64xf32>
    %370 = vector.multi_reduction <maximumf>, %369, %cst_75 [1] : vector<64x128xf32> to vector<64xf32>
    %371 = vector.shape_cast %370 : vector<64xf32> to vector<64x1xf32>
    %372 = vector.broadcast %371 : vector<64x1xf32> to vector<64x128xf32>
    %373 = arith.subf %369, %372 : vector<64x128xf32>
    %374 = math.exp %373 : vector<64x128xf32>
    %cst_76 = arith.constant dense<0.000000e+00> : vector<64xf32>
    %375 = vector.multi_reduction <add>, %374, %cst_76 [1] : vector<64x128xf32> to vector<64xf32>
    %376 = vector.shape_cast %375 : vector<64xf32> to vector<64x1xf32>
    %377 = math.log %376 : vector<64x1xf32>
    %378 = vector.broadcast %377 : vector<64x1xf32> to vector<64x128xf32>
    %379 = arith.subf %373, %378 : vector<64x128xf32>
    %c0_77 = arith.constant 0 : index
    %c0_78 = arith.constant 0 : index
    %380 = vector.load %arg8[%c0_77, %c0_78] : memref<64x128xf32, #tpu.memory_space<vmem>>, vector<64x128xf32>
    tpu.vector_store %arg8[%c0_77, %c0_78], %379 {strides = array<i32>} : memref<64x128xf32, #tpu.memory_space<vmem>>, vector<64x128xf32>,
    return
  }
}

</mosaic_0001>

<bundles_post_ra>
// kernel: rnn_model_forward.1
= control target key start
LH: loop header
LB: loop body
LE: loop exit
PB: predicated region body
PF: predicated region fallthrough
CT: control target
= control target key end

     0   :  { %v3207_v0 = vmov 0   ;;  %v3208_v15 = vmov 0.0|0.0   ;;  %s3209_s19 = smov 32   ;;  %v40_v38 = vlaneseq  ;;  %v3210_v41 = vmov 1.0   ;;  %s3213_s21 = smov 64   ;;  %s3928_s0 = inlined_call_operand.vmem [shape: s32[64,1], index: 0, kind: input, shape index: {}]   ;;  %s3929_s1 = inlined_call_operand.vmem [shape: f32[128,32], index: 1, kind: input, shape index: {}]   ;;  %s3930_s4 = inlined_call_operand.vmem [shape: f32[2,8,32], index: 4, kind: input, shape index: {}]   ;;  %s3931_s2 = inlined_call_operand.vmem [shape: f32[2,64,128], index: 2, kind: input, shape index: {}]   ;;  %s3932_s5 = inlined_call_operand.vmem [shape: f32[2,8,32], index: 5, kind: input, shape index: {}]   ;;  %s3933_s3 = inlined_call_operand.vmem [shape: f32[2,1,128], index: 3, kind: input, shape index: {}]   ;;  %s3934_s9 = inlined_call_operand.vmem [shape: f32[2,8,32], index: 9, kind: output, shape index: {1}]   ;;  %s3935_s6 = inlined_call_operand.vmem [shape: f32[32,128], index: 6, kind: input, shape index: {}]   ;;  %s3936_s7 = inlined_call_operand.vmem [shape: f32[1,128], index: 7, kind: input, shape index: {}]   ;;  %s3937_s8 = inlined_call_operand.vmem [shape: f32[64,128], index: 8, kind: output, shape index: {0}]   ;;  %s3938_s10 = inlined_call_operand.vmem [shape: f32[2,8,32], index: 10, kind: output, shape index: {2}]  }
   0x1   :  { %3044 = vset.pattern.permute.xlu0 %v3207_v0  ;;  %v32_v1 = vld [vmem:[%s3928_s0] sm:$0xff]  ;;  %3045 = vset.pattern.permute.xlu1 %v3207_v0  ;;  %v91_v3 = vld [vmem:[%s3929_s1 + $0x8] sm:$0xff]  ;;  %v92_v4 = vld [vmem:[%s3929_s1 + $0x10] sm:$0xff]  ;;  %vm3211_vm2 = vmmov 0   ;;  %v3212_v46 = vmov 0.0   ;;  %vm241_vm3 = vcmask 261120  }
   0x2   :  { %v90_v2 = vld [vmem:[%s3929_s1] sm:$0xff]  ;;  %43 = vperm.xlu0 %3044, %v32_v1   ;;  %v93_v5 = vld [vmem:[%s3929_s1 + $0x18] sm:$0xff]  ;;  %v33_v6 = vld [vmem:[%s3928_s0 + $0x8] sm:$0xff]  ;;  %2832 = vmatprep.subr.bf16.mxu1 %v3208_v15  ;;  %v3360_v39 = vand.u32 127, %v40_v38  ;;  %vm249_vm4 = vcmask 523264   ;;  %s3214_s22 = smov 96  }
   0x3   :  { %v2800_v7 = vpack.c.bf16 %v91_v3, %v90_v2  ;;  %v2804_v8 = vpack.c.bf16 %v93_v5, %v92_v4  ;;  %v94_v9 = vld [vmem:[%s3929_s1 + $0x20] sm:$0xff]  ;;  %v95_v10 = vld [vmem:[%s3929_s1 + $0x28] sm:$0xff]  ;;  %v96_v12 = vld [vmem:[%s3929_s1 + $0x30] sm:$0xff]  ;;  %2492 = vmatprep.mubr.msk.f32.mxu1 %vm3211_vm2, %v3212_v46 }
   0x4   :  { %v2808_v11 = vpack.c.bf16 %v95_v10, %v94_v9  ;;  %v97_v13 = vld [vmem:[%s3929_s1 + $0x38] sm:$0xff]  ;;  %v231_v14 = vld [vmem:[%s3930_s4] sm:$0xff]  ;;  %v212_v17 = vld [vmem:[%s3931_s2 + $0x8] sm:$0xff] }
   0x5   :  { %2801 = vmatprep.subr.bf16.mxu0 %v2800_v7  ;;  %v211_v16 = vld [vmem:[%s3931_s2] sm:$0xff]  ;;  %238 = vrot.lane.b32.xlu1 %v231_v14, %s3209_s19  ;;  %v213_v19 = vld [vmem:[%s3931_s2 + $0x10] sm:$0xff]  ;;  %v214_v20 = vld [vmem:[%s3931_s2 + $0x18] sm:$0xff]  ;;  %v2812_v21 = vpack.c.bf16 %v97_v13, %v96_v12 }
   0x6   :  { %46 = vperm.xlu0 %3044, %v33_v6   ;;  %2803 = vmatpush3.bf16.msra.mxu0 %v2800_v7  ;;  %v3311_v18 = vpack.c.bf16 %v212_v17, %v211_v16  ;;  %v98_v22 = vld [vmem:[%s3929_s1 + $0x40] sm:$0xff]  ;;  %v3323_v23 = vpack.c.bf16 %v214_v20, %v213_v19  ;;  %v99_v24 = vld [vmem:[%s3929_s1 + $0x48] sm:$0xff]  ;;  %v100_v29 = vld [vmem:[%s3929_s1 + $0x50] sm:$0xff] }
   0x7   :  { %2805 = vmatprep.subr.bf16.mxu0 %v2804_v8  ;;  %v215_v25 = vld [vmem:[%s3931_s2 + $0x20] sm:$0xff]  ;;  %v216_v26 = vld [vmem:[%s3931_s2 + $0x28] sm:$0xff]  ;;  %v2816_v27 = vpack.c.bf16 %v99_v24, %v98_v22  ;;  %v101_v30 = vld [vmem:[%s3929_s1 + $0x58] sm:$0xff] }
   0x8   :  { %2834 = vmatpush3.bf16.msra.mxu1 %v3311_v18  ;;  %v3336_v28 = vpack.c.bf16 %v216_v26, %v215_v25  ;;  %v2820_v31 = vpack.c.bf16 %v101_v30, %v100_v29  ;;  %v102_v32 = vld [vmem:[%s3929_s1 + $0x60] sm:$0xff]  ;;  %v103_v33 = vld [vmem:[%s3929_s1 + $0x68] sm:$0xff]  ;;  %v104_v35 = vld [vmem:[%s3929_s1 + $0x70] sm:$0xff] }
   0x9   :  { %2835 = vmatprep.subr.bf16.mxu1 %v3208_v15  ;;  %v2824_v34 = vpack.c.bf16 %v103_v33, %v102_v32  ;;  %v105_v36 = vld [vmem:[%s3929_s1 + $0x78] sm:$0xff]  ;;  %v217_v43 = vld [vmem:[%s3931_s2 + $0x30] sm:$0xff]  ;;  %v234_v47 = vld [vmem:[%s3932_s5] sm:$0xff] }
   0xa   :  { %2807 = vmatpush3.bf16.msra.mxu0 %v2804_v8  ;;  %v2828_v37 = vpack.c.bf16 %v105_v36, %v104_v35  ;;  %v218_v44 = vld [vmem:[%s3931_s2 + $0x38] sm:$0xff]  ;;  %331 = vrot.lane.b32.xlu0 %v234_v47, %s3209_s19  ;;  %v3399_v52 = vld [vmem:[%s3933_s3] ss:$0 sm:$0xff]  ;;  %v34_v63 = vld [vmem:[%s3928_s0 + $0x10] sm:$0xff] }
   0xb   :  { %2809 = vmatprep.subr.bf16.mxu0 %v2808_v11  ;;  %v3378_v45 = vpack.c.bf16 %v218_v44, %v217_v43  ;;  %v36_v0 = vld [vmem:[%s3928_s0 + $0x20] sm:$0xff]  ;;  %v38_v1 = vld [vmem:[%s3928_s0 + $0x30] sm:$0xff]  ;;  %v35_v7 = vld [vmem:[%s3928_s0 + $0x18] sm:$0xff] }
   0xc   :  { %2837 = vmatpush3.bf16.msra.mxu1 %v3323_v23  ;;  %v37_v9 = vld [vmem:[%s3928_s0 + $0x28] sm:$0xff]  ;;  %v39_v10 = vld [vmem:[%s3928_s0 + $0x38] sm:$0xff]  ;;  %v2196_v12 = vld [vmem:[%s3931_s2 + $0x40] sm:$0xff] }
   0xd   :  { %2838 = vmatprep.subr.bf16.mxu1 %v3208_v15  ;;  %v2197_v13 = vld [vmem:[%s3931_s2 + $0x48] sm:$0xff]  ;;  %v2198_v14 = vld [vmem:[%s3931_s2 + $0x50] sm:$0xff]  ;;  %v2199_v17 = vld [vmem:[%s3931_s2 + $0x58] sm:$0xff] }
   0xe   :  { %2811 = vmatpush3.bf16.msra.mxu0 %v2808_v11  ;;  %v2205_v11 = vld [vmem:[%s3930_s4 + $0x8] sm:$0xff]  ;;  %v3440_v16 = vpack.c.bf16 %v2197_v13, %v2196_v12  ;;  %v3447_v19 = vpack.c.bf16 %v2199_v17, %v2198_v14  ;;  %v2200_v20 = vld [vmem:[%s3931_s2 + $0x60] sm:$0xff]  ;;  %v2202_v24 = vld [vmem:[%s3931_s2 + $0x70] sm:$0xff] }
   0xf   :  { %2813 = vmatprep.subr.bf16.mxu0 %v2812_v21  ;;  %v2203_v25 = vld [vmem:[%s3931_s2 + $0x78] sm:$0xff] }
  0x10   :  { %2840 = vmatpush3.bf16.msra.mxu1 %v3336_v28  ;;  %v3467_v26 = vpack.c.bf16 %v2203_v25, %v2202_v24 }
  0x11   :  { %2841 = vmatprep.subr.bf16.mxu1 %v3208_v15 }
  0x12   :  { %2815 = vmatpush3.bf16.msra.mxu0 %v2812_v21  ;;  %v2201_v21 = vld [vmem:[%s3931_s2 + $0x68] sm:$0xff] }
  0x13   :  { %2817 = vmatprep.subr.bf16.mxu0 %v2816_v27  ;;  %v3457_v22 = vpack.c.bf16 %v2201_v21, %v2200_v20 }
  0x14   :  { %2843 = vmatpush3.bf16.msra.mxu1 %v3378_v45 }
  0x15   :  { %2844 = vmatprep.subr.bf16.mxu1 %v3208_v15 }
  0x16   :  { %2819 = vmatpush3.bf16.msra.mxu0 %v2816_v27 }
  0x17   :  { %2821 = vmatprep.subr.bf16.mxu0 %v2820_v31 }
  0x1a   :  { %2823 = vmatpush3.bf16.msra.mxu0 %v2820_v31 }
  0x1b   :  { %2825 = vmatprep.subr.bf16.mxu0 %v2824_v34 }
  0x1e   :  { %2827 = vmatpush3.bf16.msra.mxu0 %v2824_v34 }
  0x1f   :  { %2829 = vmatprep.subr.bf16.mxu0 %v2828_v37 }
  0x22   :  { %2831 = vmatpush3.bf16.msra.mxu0 %v2828_v37 }
  0x23   :  { %2856 = vmatprep.subr.bf16.mxu0 %v3208_v15 }
  0x77   :  { %v239_v48 = vpop.permute.xlu1 %238 }
  0x81   :  { %v44_v40 = vpop.permute.xlu0 %43 }
  0x82   :  { %vm66_vm0 = vcmp.eq.s32.totalorder %v3360_v39, %v44_v40 }
  0x83   :  { %2464 = vmatprep.mubr.msk.f32.mxu0 %vm66_vm0, %v3210_v41 }
  0x85   :  { %v47_v42 = vpop.permute.xlu0 %46 }
  0x86   :  { %vm67_vm1 = vcmp.eq.s32.totalorder %v3360_v39, %v47_v42 }
  0x87   :  { %2465 = vmatmul.mubr.msk.f32.vlgmr.msra.gmra.mrb[0].mxu0 %vm67_vm1, %v3210_v41 }
  0x88   :  { %2858 = vmatpush3.bf16.msra.mxu0 %v3311_v18 }
  0x89   :  { %2859 = vmatprep.subr.bf16.mxu0 %v3208_v15  ;;  %v332_v2 = vpop.permute.xlu0 %331 }
  0x8c   :  { %2861 = vmatpush3.bf16.msra.mxu0 %v3323_v23 }
  0x8d   :  { %2862 = vmatprep.subr.bf16.mxu0 %v3208_v15 }
  0x90   :  { %2864 = vmatpush3.bf16.msra.mxu0 %v3336_v28 }
  0x91   :  { %2865 = vmatprep.subr.bf16.mxu0 %v3208_v15 }
  0x94   :  { %2867 = vmatpush3.bf16.msra.mxu0 %v3378_v45 }
  0x95   :  { %2880 = vmatprep.subr.bf16.mxu0 %v3208_v15 }
 0x15a   :  { %v3390_v49 = vpop.f32.mrb[0].mxu0 }
 0x15b   :  { %v172_v50 = vpop.f32.mrb[1].mxu0 }
 0x15c   :  { %v242_v51 = vsel %vm241_vm3, %v172_v50, %v239_v48  ;;  %v3526_v48 = vld [vmem:[%s3933_s3 + $0x1] ss:$0 sm:$0xff] }
 0x15d   :  { %2493 = vmatmul.mubr.msk.f32.vlgmr.msra.gmra.mrb[0].mxu1 %vm249_vm4, %v242_v51 }
 0x15e   :  { %2511 = vmatprep.mubr.msk.f32.mxu1 %vm3211_vm2, %v3212_v46  ;;  %2846 = vmatpush3.bf16.msra.mxu1 %v3440_v16 }
 0x15f   :  { %2847 = vmatprep.subr.bf16.mxu1 %v3208_v15 }
 0x162   :  { %2849 = vmatpush3.bf16.msra.mxu1 %v3447_v19 }
 0x163   :  { %2850 = vmatprep.subr.bf16.mxu1 %v3208_v15 }
 0x166   :  { %2852 = vmatpush3.bf16.msra.mxu1 %v3457_v22 }
 0x167   :  { %2853 = vmatprep.subr.bf16.mxu1 %v3208_v15 }
 0x16a   :  { %2855 = vmatpush3.bf16.msra.mxu1 %v3467_v26 }
 0x16b   :  { %2868 = vmatprep.subr.bf16.mxu1 %v3208_v15 }
 0x230   :  { %v319_v53 = vpop.f32.mrb[0].mxu1 }
 0x231   :  { %v320_v54 = vadd.f32 %v3399_v52, %v319_v53  ;;  %v2494_v55 = vpop.f32.mrb[1].mxu1 }
 0x233   :  { %3046 = vtanh.f32 %v320_v54  ;;  %v2209_v57 = vmul.f32 -1.442695, %v320_v54 }
 0x235   :  { %3048 = vpow2.f32 %v2209_v57  ;;  %v2206_v57 = vld [vmem:[%s3932_s5 + $0x8] sm:$0xff] }
 0x23d   :  { %v3047_v56 = vpop.eup %3046 }
 0x23e   :  { %336 = vrot.lane.b32.xlu1 %v3047_v56, %s3209_s19 }
 0x23f   :  { %v3049_v58 = vpop.eup %3048 }
 0x240   :  { %v326_v59 = vadd.f32 1.0, %v3049_v58 }
 0x242   :  { %3050 = vrcp.f32 %v326_v59 }
 0x24c   :  { %v3051_v60 = vpop.eup %3050 }
 0x24d   :  { %v334_v3 = vmul.f32 %v3051_v60, %v332_v2 }
 0x2b0   :  { %v337_v61 = vpop.permute.xlu1 %336 }
 0x2b1   :  { %v339_v62 = vmul.f32 %v3051_v60, %v337_v61 }
 0x2b3   :  { %341 = vrot.lane.b32.xlu1 %v339_v62, %s3209_s19 }
 0x2b7   :  { %49 = vperm.xlu1 %3045, %v34_v63  }
 0x2bb   :  { %55 = vperm.xlu1 %3045, %v36_v0  }
 0x2bf   :  { %61 = vperm.xlu1 %3045, %v38_v1  }
 0x325   :  { %v342_v4 = vpop.permute.xlu1 %341 }
 0x326   :  { %v3413_v5 = vadd.f32 %v342_v4, %v334_v3 }
 0x328   :  { %3052 = vtanh.f32 %v3413_v5 }
 0x332   :  { %v3053_v6 = vpop.eup %3052 }
 0x333   :  { %347 = vrot.lane.b32.xlu0 %v3053_v6, %s3209_s19 }
 0x336   :  { %v50_v8 = vpop.permute.xlu1 %49 }
 0x337   :  { %52 = vperm.xlu0 %3044, %v35_v7   ;;  %vm68_vm5 = vcmp.eq.s32.totalorder %v3360_v39, %v50_v8 }
 0x338   :  { %2467 = vmatprep.mubr.msk.f32.mxu0 %vm68_vm5, %v3210_v41 }
 0x33a   :  { %v56_v30 = vpop.permute.xlu1 %55 }
 0x33b   :  { %58 = vperm.xlu0 %3044, %v37_v9   ;;  %vm70_vm6 = vcmp.eq.s32.totalorder %v3360_v39, %v56_v30 }
 0x33e   :  { %v62_v32 = vpop.permute.xlu1 %61 }
 0x33f   :  { %64 = vperm.xlu0 %3044, %v39_v10   ;;  %vm72_vm8 = vcmp.eq.s32.totalorder %v3360_v39, %v62_v32 }
 0x343   :  { %356 = vrot.lane.b32.xlu0 %v2205_v11, %s3209_s19 }
 0x3a5   :  { %v348_v27 = vpop.permute.xlu0 %347 }
 0x3a6   :  { %v350_v29 = vmul.f32 %v3051_v60, %v348_v27 }
 0x3a8   :  { %352 = vrot.lane.b32.xlu1 %v350_v29, %s3213_s21 }
 0x3ac   :  { %467 = vrot.lane.b32.xlu1 %v350_v29, %s3214_s22 }
 0x3b6   :  { %v53_v31 = vpop.permute.xlu0 %52 }
 0x3b7   :  { %vm69_vm7 = vcmp.eq.s32.totalorder %v3360_v39, %v53_v31 }
 0x3b8   :  { %2468 = vmatmul.mubr.msk.f32.gmra.mrb[2].mxu0 %vm69_vm7, %v3210_v41 }
 0x3b9   :  { %2470 = vmatprep.mubr.msk.f32.mxu0 %vm70_vm6, %v3210_v41 }
 0x3ba   :  { %v59_v33 = vpop.permute.xlu0 %58 }
 0x3bb   :  { %vm71_vm9 = vcmp.eq.s32.totalorder %v3360_v39, %v59_v33 }
 0x3bc   :  { %2471 = vmatmul.mubr.msk.f32.gmra.mrb[4].mxu0 %vm71_vm9, %v3210_v41 }
 0x3bd   :  { %2473 = vmatprep.mubr.msk.f32.mxu0 %vm72_vm8, %v3210_v41 }
 0x3be   :  { %v65_v34 = vpop.permute.xlu0 %64 }
 0x3bf   :  { %vm73_vm10 = vcmp.eq.s32.totalorder %v3360_v39, %v65_v34 }
 0x3c0   :  { %2474 = vmatmul.mubr.msk.f32.gmra.mrb[6].mxu0 %vm73_vm10, %v3210_v41 }
 0x3c1   :  { %2530 = vmatprep.mubr.msk.f32.mxu0 %vm3211_vm2, %v3212_v46 }
 0x3c2   :  { %v357_v35 = vpop.permute.xlu0 %356 }
 0x41a   :  { %v353_v36 = vpop.permute.xlu1 %352 }
 0x41b   :  { %v359_v37 = vsel %vm241_vm3, %v353_v36, %v357_v35 }
 0x41c   :  { %2512 = vmatmul.mubr.msk.f32.vlgmr.msra.gmra.mrb[2].mxu1 %vm249_vm4, %v359_v37 }
 0x41d   :  { %2870 = vmatpush3.bf16.msra.mxu1 %v3440_v16  ;;  %2549 = vmatprep.mubr.msk.f32.mxu1 %vm3211_vm2, %v3212_v46 }
 0x41e   :  { %v468_v38 = vpop.permute.xlu1 %467  ;;  %2871 = vmatprep.subr.bf16.mxu1 %v3208_v15 }
 0x41f   :  { %v470_v39 = vsel %vm241_vm3, %v3390_v49, %v468_v38 }
 0x420   :  { %2531 = vmatmul.mubr.msk.f32.vlgmr.msra.gmra.mrb[8].mxu0 %vm249_vm4, %v470_v39 }
 0x421   :  { %2873 = vmatpush3.bf16.msra.mxu1 %v3447_v19  ;;  %2882 = vmatpush3.bf16.msra.mxu0 %v3311_v18 }
 0x422   :  { %2874 = vmatprep.subr.bf16.mxu1 %v3208_v15  ;;  %2883 = vmatprep.subr.bf16.mxu0 %v3208_v15 }
 0x423   :  { %2568 = vmatprep.mubr.msk.f32.mxu0 %vm3211_vm2, %v3212_v46 }
 0x425   :  { %2876 = vmatpush3.bf16.msra.mxu1 %v3457_v22  ;;  %2885 = vmatpush3.bf16.msra.mxu0 %v3323_v23 }
 0x426   :  { %2877 = vmatprep.subr.bf16.mxu1 %v3208_v15  ;;  %2886 = vmatprep.subr.bf16.mxu0 %v3208_v15 }
 0x429   :  { %2879 = vmatpush3.bf16.msra.mxu1 %v3467_v26  ;;  %2888 = vmatpush3.bf16.msra.mxu0 %v3336_v28 }
 0x42a   :  { %2889 = vmatprep.subr.bf16.mxu0 %v3208_v15  ;;  %2892 = vmatprep.subr.bf16.mxu1 %v3208_v15 }
 0x42d   :  { %2891 = vmatpush3.bf16.msra.mxu0 %v3378_v45 }
 0x42e   :  { %2904 = vmatprep.subr.bf16.mxu0 %v3208_v15 }
 0x48b   :  { %v3511_v40 = vpop.f32.mrb[2].mxu0 }
 0x48c   :  { %v3513_v41 = vpop.f32.mrb[3].mxu0 }
 0x48f   :  { %v3515_v42 = vpop.f32.mrb[4].mxu0 }
 0x490   :  { %v3517_v43 = vpop.f32.mrb[5].mxu0 }
 0x493   :  { %v3519_v44 = vpop.f32.mrb[6].mxu0 }
 0x494   :  { %v3521_v47 = vpop.f32.mrb[7].mxu0 }
 0x4ef   :  { %v435_v49 = vpop.f32.mrb[2].mxu1 }
 0x4f0   :  { %v436_v50 = vadd.f32 %v3526_v48, %v435_v49  ;;  %v2513_v51 = vpop.f32.mrb[3].mxu1 }
 0x4f2   :  { %3054 = vtanh.f32 %v436_v50  ;;  %v2212_v59 = vmul.f32 -1.442695, %v436_v50 }
 0x4f3   :  { %v540_v53 = vpop.f32.mrb[8].mxu0 }
 0x4f4   :  { %v541_v54 = vadd.f32 %v3399_v52, %v540_v53  ;;  %v2532_v55 = vpop.f32.mrb[9].mxu0 }
 0x4f6   :  { %3056 = vtanh.f32 %v541_v54  ;;  %v2214_v60 = vmul.f32 -1.442695, %v541_v54 }
 0x4f7   :  { %3058 = vpow2.f32 %v2212_v59 }
 0x4f8   :  { %3060 = vpow2.f32 %v2214_v60 }
 0x4fc   :  { %v3055_v56 = vpop.eup %3054 }
 0x4fd   :  { %452 = vrot.lane.b32.xlu0 %v3055_v56, %s3209_s19 }
 0x500   :  { %v3057_v58 = vpop.eup %3056 }
 0x501   :  { %553 = vrot.lane.b32.xlu1 %v3057_v58, %s3209_s19  ;;  %447 = vrot.lane.b32.xlu0 %v2206_v57, %s3209_s19  ;;  %v3059_v61 = vpop.eup %3058 }
 0x502   :  { %v442_v62 = vadd.f32 1.0, %v3059_v61  ;;  %v3061_v63 = vpop.eup %3060 }
 0x503   :  { %v547_v0 = vadd.f32 1.0, %v3061_v63 }
 0x504   :  { %3062 = vrcp.f32 %v442_v62 }
 0x505   :  { %3064 = vrcp.f32 %v547_v0 }
 0x50e   :  { %v3063_v1 = vpop.eup %3062 }
 0x50f   :  { %v3065_v4 = vpop.eup %3064 }
 0x510   :  { %v551_v12 = vmul.f32 %v3065_v4, %v3413_v5 }
 0x56f   :  { %v453_v2 = vpop.permute.xlu0 %452 }
 0x570   :  { %v455_v3 = vmul.f32 %v3063_v1, %v453_v2 }
 0x572   :  { %457 = vrot.lane.b32.xlu1 %v455_v3, %s3209_s19 }
 0x573   :  { %v554_v6 = vpop.permute.xlu1 %553  ;;  %v448_v8 = vpop.permute.xlu0 %447 }
 0x574   :  { %v556_v7 = vmul.f32 %v3065_v4, %v554_v6  ;;  %v450_v9 = vmul.f32 %v3063_v1, %v448_v8 }
 0x576   :  { %558 = vrot.lane.b32.xlu0 %v556_v7, %s3209_s19 }
 0x5e4   :  { %v458_v10 = vpop.permute.xlu1 %457 }
 0x5e5   :  { %v3538_v11 = vadd.f32 %v458_v10, %v450_v9 }
 0x5e7   :  { %3066 = vtanh.f32 %v3538_v11 }
 0x5e8   :  { %v559_v13 = vpop.permute.xlu0 %558 }
 0x5e9   :  { %v3542_v14 = vadd.f32 %v559_v13, %v551_v12 }
 0x5eb   :  { %3068 = vtanh.f32 %v3542_v14 }
 0x5f1   :  { %v3067_v17 = vpop.eup %3066 }
 0x5f2   :  { %463 = vrot.lane.b32.xlu1 %v3067_v17, %s3209_s19 }
 0x5f5   :  { %v3069_v20 = vpop.eup %3068 }
 0x5f6   :  { %564 = vrot.lane.b32.xlu0 %v3069_v20, %s3209_s19 }
 0x664   :  { %v464_v21 = vpop.permute.xlu1 %463 }
 0x665   :  { %v3547_v24 = vmul.f32 %v3063_v1, %v464_v21 }
 0x667   :  { %573 = vrot.lane.b32.xlu0 %v3547_v24, %s3214_s22 }
 0x668   :  { %v565_v25 = vpop.permute.xlu0 %564 }
 0x669   :  { %v567_v27 = vmul.f32 %v3065_v4, %v565_v25 }
 0x66b   :  { %569 = vrot.lane.b32.xlu1 %v567_v27, %s3213_s21 }
 0x66f   :  { %674 = vrot.lane.b32.xlu1 %v567_v27, %s3214_s22 }
 0x6d9   :  { %v574_v5 = vpop.permute.xlu0 %573 }
 0x6dd   :  { %v570_v29 = vpop.permute.xlu1 %569 }
 0x6de   :  { %v576_v30 = vsel %vm241_vm3, %v570_v29, %v574_v5 }
 0x6df   :  { %2550 = vmatmul.mubr.msk.f32.vlgmr.msra.gmra.mrb[4].mxu1 %vm249_vm4, %v576_v30 }
 0x6e0   :  { %2894 = vmatpush3.bf16.msra.mxu1 %v3440_v16  ;;  %2587 = vmatprep.mubr.msk.f32.mxu1 %vm3211_vm2, %v3212_v46 }
 0x6e1   :  { %v675_v31 = vpop.permute.xlu1 %674  ;;  %2895 = vmatprep.subr.bf16.mxu1 %v3208_v15 }
 0x6e2   :  { %v677_v32 = vsel %vm241_vm3, %v3513_v41, %v675_v31 }
 0x6e3   :  { %2569 = vmatmul.mubr.msk.f32.vlgmr.msra.gmra.mrb[10].mxu0 %vm249_vm4, %v677_v32 }
 0x6e4   :  { %2897 = vmatpush3.bf16.msra.mxu1 %v3447_v19  ;;  %2906 = vmatpush3.bf16.msra.mxu0 %v3311_v18 }
 0x6e5   :  { %2898 = vmatprep.subr.bf16.mxu1 %v3208_v15  ;;  %2907 = vmatprep.subr.bf16.mxu0 %v3208_v15 }
 0x6e6   :  { %2606 = vmatprep.mubr.msk.f32.mxu0 %vm3211_vm2, %v3212_v46 }
 0x6e8   :  { %2900 = vmatpush3.bf16.msra.mxu1 %v3457_v22  ;;  %2909 = vmatpush3.bf16.msra.mxu0 %v3323_v23 }
 0x6e9   :  { %2901 = vmatprep.subr.bf16.mxu1 %v3208_v15  ;;  %2910 = vmatprep.subr.bf16.mxu0 %v3208_v15 }
 0x6ec   :  { %2903 = vmatpush3.bf16.msra.mxu1 %v3467_v26  ;;  %2912 = vmatpush3.bf16.msra.mxu0 %v3336_v28 }
 0x6ed   :  { %2913 = vmatprep.subr.bf16.mxu0 %v3208_v15  ;;  %2916 = vmatprep.subr.bf16.mxu1 %v3208_v15 }
 0x6f0   :  { %2915 = vmatpush3.bf16.msra.mxu0 %v3378_v45 }
 0x6f1   :  { %2928 = vmatprep.subr.bf16.mxu0 %v3208_v15 }
 0x7b2   :  { %v646_v33 = vpop.f32.mrb[4].mxu1 }
 0x7b3   :  { %v647_v34 = vadd.f32 %v3526_v48, %v646_v33  ;;  %v2551_v35 = vpop.f32.mrb[5].mxu1 }
 0x7b5   :  { %3070 = vtanh.f32 %v647_v34  ;;  %v2216_v49 = vmul.f32 -1.442695, %v647_v34 }
 0x7b6   :  { %v747_v36 = vpop.f32.mrb[10].mxu0 }
 0x7b7   :  { %v748_v37 = vadd.f32 %v3399_v52, %v747_v36  ;;  %v2570_v38 = vpop.f32.mrb[11].mxu0 }
 0x7b9   :  { %3072 = vtanh.f32 %v748_v37  ;;  %v2218_v50 = vmul.f32 -1.442695, %v748_v37 }
 0x7ba   :  { %3074 = vpow2.f32 %v2216_v49 }
 0x7bb   :  { %3076 = vpow2.f32 %v2218_v50 }
 0x7bf   :  { %v3071_v39 = vpop.eup %3070 }
 0x7c0   :  { %659 = vrot.lane.b32.xlu0 %v3071_v39, %s3209_s19 }
 0x7c3   :  { %v3073_v41 = vpop.eup %3072 }
 0x7c4   :  { %760 = vrot.lane.b32.xlu1 %v3073_v41, %s3209_s19  ;;  %v3075_v51 = vpop.eup %3074 }
 0x7c5   :  { %v653_v53 = vadd.f32 1.0, %v3075_v51  ;;  %v3077_v54 = vpop.eup %3076 }
 0x7c6   :  { %v754_v55 = vadd.f32 1.0, %v3077_v54 }
 0x7c7   :  { %3078 = vrcp.f32 %v653_v53 }
 0x7c8   :  { %3080 = vrcp.f32 %v754_v55 }
 0x7d1   :  { %v3079_v56 = vpop.eup %3078 }
 0x7d2   :  { %v3081_v59 = vpop.eup %3080  ;;  %v657_v62 = vmul.f32 %v3079_v56, %v3538_v11 }
 0x7d3   :  { %v758_v1 = vmul.f32 %v3081_v59, %v3542_v14 }
 0x832   :  { %v660_v57 = vpop.permute.xlu0 %659 }
 0x833   :  { %v662_v58 = vmul.f32 %v3079_v56, %v660_v57 }
 0x835   :  { %664 = vrot.lane.b32.xlu0 %v662_v58, %s3209_s19 }
 0x836   :  { %v761_v60 = vpop.permute.xlu1 %760 }
 0x837   :  { %v763_v61 = vmul.f32 %v3081_v59, %v761_v60 }
 0x839   :  { %765 = vrot.lane.b32.xlu1 %v763_v61, %s3209_s19 }
 0x8a7   :  { %v665_v63 = vpop.permute.xlu0 %664 }
 0x8a8   :  { %v3585_v0 = vadd.f32 %v665_v63, %v657_v62 }
 0x8aa   :  { %3082 = vtanh.f32 %v3585_v0 }
 0x8ab   :  { %v766_v2 = vpop.permute.xlu1 %765 }
 0x8ac   :  { %v3589_v3 = vadd.f32 %v766_v2, %v758_v1 }
 0x8ae   :  { %3084 = vtanh.f32 %v3589_v3 }
 0x8b4   :  { %v3083_v4 = vpop.eup %3082 }
 0x8b5   :  { %670 = vrot.lane.b32.xlu0 %v3083_v4, %s3209_s19 }
 0x8b8   :  { %v3085_v6 = vpop.eup %3084 }
 0x8b9   :  { %771 = vrot.lane.b32.xlu1 %v3085_v6, %s3209_s19 }
 0x927   :  { %v671_v7 = vpop.permute.xlu0 %670 }
 0x928   :  { %v3594_v8 = vmul.f32 %v3079_v56, %v671_v7 }
 0x92a   :  { %780 = vrot.lane.b32.xlu1 %v3594_v8, %s3214_s22 }
 0x92b   :  { %v772_v9 = vpop.permute.xlu1 %771 }
 0x92c   :  { %v774_v10 = vmul.f32 %v3081_v59, %v772_v9 }
 0x92e   :  { %776 = vrot.lane.b32.xlu0 %v774_v10, %s3213_s21 }
 0x932   :  { %881 = vrot.lane.b32.xlu0 %v774_v10, %s3214_s22 }
 0x99c   :  { %v781_v11 = vpop.permute.xlu1 %780 }
 0x9a0   :  { %v777_v12 = vpop.permute.xlu0 %776 }
 0x9a1   :  { %v783_v13 = vsel %vm241_vm3, %v777_v12, %v781_v11 }
 0x9a2   :  { %2588 = vmatmul.mubr.msk.f32.vlgmr.msra.gmra.mrb[6].mxu1 %vm249_vm4, %v783_v13 }
 0x9a3   :  { %2918 = vmatpush3.bf16.msra.mxu1 %v3440_v16  ;;  %2625 = vmatprep.mubr.msk.f32.mxu1 %vm3211_vm2, %v3212_v46 }
 0x9a4   :  { %v882_v14 = vpop.permute.xlu0 %881  ;;  %2919 = vmatprep.subr.bf16.mxu1 %v3208_v15 }
 0x9a5   :  { %v884_v17 = vsel %vm241_vm3, %v3511_v40, %v882_v14 }
 0x9a6   :  { %2607 = vmatmul.mubr.msk.f32.vlgmr.msra.gmra.mrb[12].mxu0 %vm249_vm4, %v884_v17 }
 0x9a7   :  { %2921 = vmatpush3.bf16.msra.mxu1 %v3447_v19  ;;  %2930 = vmatpush3.bf16.msra.mxu0 %v3311_v18 }
 0x9a8   :  { %2922 = vmatprep.subr.bf16.mxu1 %v3208_v15  ;;  %2931 = vmatprep.subr.bf16.mxu0 %v3208_v15 }
 0x9a9   :  { %2644 = vmatprep.mubr.msk.f32.mxu0 %vm3211_vm2, %v3212_v46 }
 0x9ab   :  { %2924 = vmatpush3.bf16.msra.mxu1 %v3457_v22  ;;  %2933 = vmatpush3.bf16.msra.mxu0 %v3323_v23 }
 0x9ac   :  { %2925 = vmatprep.subr.bf16.mxu1 %v3208_v15  ;;  %2934 = vmatprep.subr.bf16.mxu0 %v3208_v15 }
 0x9af   :  { %2927 = vmatpush3.bf16.msra.mxu1 %v3467_v26  ;;  %2936 = vmatpush3.bf16.msra.mxu0 %v3336_v28 }
 0x9b0   :  { %2937 = vmatprep.subr.bf16.mxu0 %v3208_v15  ;;  %2940 = vmatprep.subr.bf16.mxu1 %v3208_v15 }
 0x9b3   :  { %2939 = vmatpush3.bf16.msra.mxu0 %v3378_v45 }
 0x9b4   :  { %2952 = vmatprep.subr.bf16.mxu0 %v3208_v15 }
 0xa75   :  { %v853_v40 = vpop.f32.mrb[6].mxu1 }
 0xa76   :  { %v854_v20 = vadd.f32 %v3526_v48, %v853_v40  ;;  %v2589_v21 = vpop.f32.mrb[7].mxu1 }
 0xa78   :  { %3086 = vtanh.f32 %v854_v20  ;;  %v2220_v31 = vmul.f32 -1.442695, %v854_v20 }
 0xa79   :  { %v954_v25 = vpop.f32.mrb[12].mxu0 }
 0xa7a   :  { %v955_v27 = vadd.f32 %v3399_v52, %v954_v25  ;;  %v2608_v5 = vpop.f32.mrb[13].mxu0 }
 0xa7c   :  { %3088 = vtanh.f32 %v955_v27  ;;  %v2222_v32 = vmul.f32 -1.442695, %v955_v27 }
 0xa7d   :  { %3090 = vpow2.f32 %v2220_v31 }
 0xa7e   :  { %3092 = vpow2.f32 %v2222_v32 }
 0xa82   :  { %v3087_v29 = vpop.eup %3086 }
 0xa83   :  { %866 = vrot.lane.b32.xlu1 %v3087_v29, %s3209_s19 }
 0xa86   :  { %v3089_v30 = vpop.eup %3088 }
 0xa87   :  { %967 = vrot.lane.b32.xlu0 %v3089_v30, %s3209_s19  ;;  %v3091_v33 = vpop.eup %3090 }
 0xa88   :  { %v860_v34 = vadd.f32 1.0, %v3091_v33  ;;  %v3093_v35 = vpop.eup %3092 }
 0xa89   :  { %v961_v36 = vadd.f32 1.0, %v3093_v35 }
 0xa8a   :  { %3094 = vrcp.f32 %v860_v34 }
 0xa8b   :  { %3096 = vrcp.f32 %v961_v36 }
 0xa94   :  { %v3095_v37 = vpop.eup %3094 }
 0xa95   :  { %v3097_v41 = vpop.eup %3096  ;;  %v864_v51 = vmul.f32 %v3095_v37, %v3585_v0 }
 0xa96   :  { %v965_v55 = vmul.f32 %v3097_v41, %v3589_v3 }
 0xaf5   :  { %v867_v38 = vpop.permute.xlu1 %866 }
 0xaf6   :  { %v869_v39 = vmul.f32 %v3095_v37, %v867_v38 }
 0xaf8   :  { %871 = vrot.lane.b32.xlu1 %v869_v39, %s3209_s19 }
 0xaf9   :  { %v968_v49 = vpop.permute.xlu0 %967 }
 0xafa   :  { %v970_v50 = vmul.f32 %v3097_v41, %v968_v49 }
 0xafc   :  { %972 = vrot.lane.b32.xlu0 %v970_v50, %s3209_s19 }
 0xb6a   :  { %v872_v53 = vpop.permute.xlu1 %871 }
 0xb6b   :  { %v3632_v54 = vadd.f32 %v872_v53, %v864_v51 }
 0xb6d   :  { %3098 = vtanh.f32 %v3632_v54 }
 0xb6e   :  { %v973_v56 = vpop.permute.xlu0 %972 }
 0xb6f   :  { %v3636_v57 = vadd.f32 %v973_v56, %v965_v55 }
 0xb71   :  { %3100 = vtanh.f32 %v3636_v57 }
 0xb77   :  { %v3099_v58 = vpop.eup %3098 }
 0xb78   :  { %877 = vrot.lane.b32.xlu1 %v3099_v58, %s3209_s19 }
 0xb7b   :  { %v3101_v59 = vpop.eup %3100 }
 0xb7c   :  { %978 = vrot.lane.b32.xlu0 %v3101_v59, %s3209_s19 }
 0xbea   :  { %v878_v60 = vpop.permute.xlu1 %877 }
 0xbeb   :  { %v3641_v61 = vmul.f32 %v3095_v37, %v878_v60 }
 0xbed   :  { %987 = vrot.lane.b32.xlu0 %v3641_v61, %s3214_s22 }
 0xbee   :  { %v979_v62 = vpop.permute.xlu0 %978 }
 0xbef   :  { %v981_v63 = vmul.f32 %v3097_v41, %v979_v62 }
 0xbf1   :  { %983 = vrot.lane.b32.xlu1 %v981_v63, %s3213_s21 }
 0xbf5   :  { %1088 = vrot.lane.b32.xlu1 %v981_v63, %s3214_s22 }
 0xc5f   :  { %v988_v0 = vpop.permute.xlu0 %987 }
 0xc63   :  { %v984_v1 = vpop.permute.xlu1 %983 }
 0xc64   :  { %v990_v2 = vsel %vm241_vm3, %v984_v1, %v988_v0 }
 0xc65   :  { %2626 = vmatmul.mubr.msk.f32.vlgmr.msra.gmra.mrb[8].mxu1 %vm249_vm4, %v990_v2 }
 0xc66   :  { %2942 = vmatpush3.bf16.msra.mxu1 %v3440_v16  ;;  %2663 = vmatprep.mubr.msk.f32.mxu1 %vm3211_vm2, %v3212_v46 }
 0xc67   :  { %v1089_v3 = vpop.permute.xlu1 %1088  ;;  %2943 = vmatprep.subr.bf16.mxu1 %v3208_v15 }
 0xc68   :  { %v1091_v4 = vsel %vm241_vm3, %v3517_v43, %v1089_v3 }
 0xc69   :  { %2645 = vmatmul.mubr.msk.f32.vlgmr.msra.gmra.mrb[14].mxu0 %vm249_vm4, %v1091_v4 }
 0xc6a   :  { %2945 = vmatpush3.bf16.msra.mxu1 %v3447_v19  ;;  %2954 = vmatpush3.bf16.msra.mxu0 %v3311_v18 }
 0xc6b   :  { %2946 = vmatprep.subr.bf16.mxu1 %v3208_v15  ;;  %2955 = vmatprep.subr.bf16.mxu0 %v3208_v15 }
 0xc6c   :  { %2682 = vmatprep.mubr.msk.f32.mxu0 %vm3211_vm2, %v3212_v46 }
 0xc6e   :  { %2948 = vmatpush3.bf16.msra.mxu1 %v3457_v22  ;;  %2957 = vmatpush3.bf16.msra.mxu0 %v3323_v23 }
 0xc6f   :  { %2949 = vmatprep.subr.bf16.mxu1 %v3208_v15  ;;  %2958 = vmatprep.subr.bf16.mxu0 %v3208_v15 }
 0xc72   :  { %2951 = vmatpush3.bf16.msra.mxu1 %v3467_v26  ;;  %2960 = vmatpush3.bf16.msra.mxu0 %v3336_v28 }
 0xc73   :  { %2961 = vmatprep.subr.bf16.mxu0 %v3208_v15  ;;  %2964 = vmatprep.subr.bf16.mxu1 %v3208_v15 }
 0xc76   :  { %2963 = vmatpush3.bf16.msra.mxu0 %v3378_v45 }
 0xc77   :  { %2976 = vmatprep.subr.bf16.mxu0 %v3208_v15 }
 0xd38   :  { %v1060_v43 = vpop.f32.mrb[8].mxu1 }
 0xd39   :  { %v1061_v6 = vadd.f32 %v3526_v48, %v1060_v43  ;;  %v2627_v7 = vpop.f32.mrb[9].mxu1 }
 0xd3b   :  { %3102 = vtanh.f32 %v1061_v6  ;;  %v2224_v14 = vmul.f32 -1.442695, %v1061_v6 }
 0xd3c   :  { %v1161_v9 = vpop.f32.mrb[14].mxu0 }
 0xd3d   :  { %v1162_v10 = vadd.f32 %v3399_v52, %v1161_v9  ;;  %v2646_v11 = vpop.f32.mrb[15].mxu0 }
 0xd3f   :  { %3104 = vtanh.f32 %v1162_v10  ;;  %v2226_v17 = vmul.f32 -1.442695, %v1162_v10 }
 0xd40   :  { %3106 = vpow2.f32 %v2224_v14 }
 0xd41   :  { %3108 = vpow2.f32 %v2226_v17 }
 0xd45   :  { %v3103_v12 = vpop.eup %3102 }
 0xd46   :  { %1073 = vrot.lane.b32.xlu0 %v3103_v12, %s3209_s19 }
 0xd49   :  { %v3105_v13 = vpop.eup %3104 }
 0xd4a   :  { %1174 = vrot.lane.b32.xlu1 %v3105_v13, %s3209_s19  ;;  %v3107_v40 = vpop.eup %3106 }
 0xd4b   :  { %v1067_v20 = vadd.f32 1.0, %v3107_v40  ;;  %v3109_v21 = vpop.eup %3108 }
 0xd4c   :  { %v1168_v25 = vadd.f32 1.0, %v3109_v21 }
 0xd4d   :  { %3110 = vrcp.f32 %v1067_v20 }
 0xd4e   :  { %3112 = vrcp.f32 %v1168_v25 }
 0xd57   :  { %v3111_v27 = vpop.eup %3110 }
 0xd58   :  { %v3113_v30 = vpop.eup %3112  ;;  %v1071_v33 = vmul.f32 %v3111_v27, %v3632_v54 }
 0xd59   :  { %v1172_v36 = vmul.f32 %v3113_v30, %v3636_v57 }
 0xdb8   :  { %v1074_v5 = vpop.permute.xlu0 %1073 }
 0xdb9   :  { %v1076_v29 = vmul.f32 %v3111_v27, %v1074_v5 }
 0xdbb   :  { %1078 = vrot.lane.b32.xlu0 %v1076_v29, %s3209_s19 }
 0xdbc   :  { %v1175_v31 = vpop.permute.xlu1 %1174 }
 0xdbd   :  { %v1177_v32 = vmul.f32 %v3113_v30, %v1175_v31 }
 0xdbf   :  { %1179 = vrot.lane.b32.xlu1 %v1177_v32, %s3209_s19 }
 0xe2d   :  { %v1079_v34 = vpop.permute.xlu0 %1078 }
 0xe2e   :  { %v3679_v35 = vadd.f32 %v1079_v34, %v1071_v33 }
 0xe30   :  { %3114 = vtanh.f32 %v3679_v35 }
 0xe31   :  { %v1180_v37 = vpop.permute.xlu1 %1179 }
 0xe32   :  { %v3683_v38 = vadd.f32 %v1180_v37, %v1172_v36 }
 0xe34   :  { %3116 = vtanh.f32 %v3683_v38 }
 0xe3a   :  { %v3115_v39 = vpop.eup %3114 }
 0xe3b   :  { %1084 = vrot.lane.b32.xlu0 %v3115_v39, %s3209_s19 }
 0xe3e   :  { %v3117_v41 = vpop.eup %3116 }
 0xe3f   :  { %1185 = vrot.lane.b32.xlu1 %v3117_v41, %s3209_s19 }
 0xead   :  { %v1085_v49 = vpop.permute.xlu0 %1084 }
 0xeae   :  { %v3688_v50 = vmul.f32 %v3111_v27, %v1085_v49 }
 0xeb0   :  { %1194 = vrot.lane.b32.xlu1 %v3688_v50, %s3214_s22 }
 0xeb1   :  { %v1186_v51 = vpop.permute.xlu1 %1185 }
 0xeb2   :  { %v1188_v53 = vmul.f32 %v3113_v30, %v1186_v51 }
 0xeb4   :  { %1190 = vrot.lane.b32.xlu0 %v1188_v53, %s3213_s21 }
 0xeb8   :  { %1295 = vrot.lane.b32.xlu0 %v1188_v53, %s3214_s22 }
 0xf22   :  { %v1195_v54 = vpop.permute.xlu1 %1194 }
 0xf26   :  { %v1191_v55 = vpop.permute.xlu0 %1190 }
 0xf27   :  { %v1197_v56 = vsel %vm241_vm3, %v1191_v55, %v1195_v54 }
 0xf28   :  { %2664 = vmatmul.mubr.msk.f32.vlgmr.msra.gmra.mrb[10].mxu1 %vm249_vm4, %v1197_v56 }
 0xf29   :  { %2966 = vmatpush3.bf16.msra.mxu1 %v3440_v16  ;;  %2701 = vmatprep.mubr.msk.f32.mxu1 %vm3211_vm2, %v3212_v46 }
 0xf2a   :  { %v1296_v57 = vpop.permute.xlu0 %1295  ;;  %2967 = vmatprep.subr.bf16.mxu1 %v3208_v15 }
 0xf2b   :  { %v1298_v58 = vsel %vm241_vm3, %v3515_v42, %v1296_v57 }
 0xf2c   :  { %2683 = vmatmul.mubr.msk.f32.vlgmr.msra.gmra.mrb[16].mxu0 %vm249_vm4, %v1298_v58 }
 0xf2d   :  { %2969 = vmatpush3.bf16.msra.mxu1 %v3447_v19  ;;  %2978 = vmatpush3.bf16.msra.mxu0 %v3311_v18 }
 0xf2e   :  { %2970 = vmatprep.subr.bf16.mxu1 %v3208_v15  ;;  %2979 = vmatprep.subr.bf16.mxu0 %v3208_v15 }
 0xf2f   :  { %2720 = vmatprep.mubr.msk.f32.mxu0 %vm3211_vm2, %v3212_v46 }
 0xf31   :  { %2972 = vmatpush3.bf16.msra.mxu1 %v3457_v22  ;;  %2981 = vmatpush3.bf16.msra.mxu0 %v3323_v23 }
 0xf32   :  { %2973 = vmatprep.subr.bf16.mxu1 %v3208_v15  ;;  %2982 = vmatprep.subr.bf16.mxu0 %v3208_v15 }
 0xf35   :  { %2975 = vmatpush3.bf16.msra.mxu1 %v3467_v26  ;;  %2984 = vmatpush3.bf16.msra.mxu0 %v3336_v28 }
 0xf36   :  { %2985 = vmatprep.subr.bf16.mxu0 %v3208_v15  ;;  %2988 = vmatprep.subr.bf16.mxu1 %v3208_v15 }
 0xf39   :  { %2987 = vmatpush3.bf16.msra.mxu0 %v3378_v45 }
 0xf3a   :  { %3000 = vmatprep.subr.bf16.mxu0 %v3208_v15 }
 0xffb   :  { %v1267_v42 = vpop.f32.mrb[10].mxu1 }
 0xffc   :  { %v1268_v59 = vadd.f32 %v3526_v48, %v1267_v42  ;;  %v2665_v60 = vpop.f32.mrb[11].mxu1 }
 0xffe   :  { %3118 = vtanh.f32 %v1268_v59  ;;  %v2228_v3 = vmul.f32 -1.442695, %v1268_v59 }
 0xfff   :  { %v1368_v62 = vpop.f32.mrb[16].mxu0 }
0x1000   :  { %v1369_v63 = vadd.f32 %v3399_v52, %v1368_v62  ;;  %v2684_v0 = vpop.f32.mrb[17].mxu0 }
0x1002   :  { %3120 = vtanh.f32 %v1369_v63  ;;  %v2230_v4 = vmul.f32 -1.442695, %v1369_v63 }
0x1003   :  { %3122 = vpow2.f32 %v2228_v3 }
0x1004   :  { %3124 = vpow2.f32 %v2230_v4 }
0x1008   :  { %v3119_v1 = vpop.eup %3118 }
0x1009   :  { %1280 = vrot.lane.b32.xlu1 %v3119_v1, %s3209_s19 }
0x100c   :  { %v3121_v2 = vpop.eup %3120 }
0x100d   :  { %1381 = vrot.lane.b32.xlu0 %v3121_v2, %s3209_s19  ;;  %v3123_v43 = vpop.eup %3122 }
0x100e   :  { %v1274_v6 = vadd.f32 1.0, %v3123_v43  ;;  %v3125_v7 = vpop.eup %3124 }
0x100f   :  { %v1375_v9 = vadd.f32 1.0, %v3125_v7 }
0x1010   :  { %3126 = vrcp.f32 %v1274_v6 }
0x1011   :  { %3128 = vrcp.f32 %v1375_v9 }
0x101a   :  { %v3127_v10 = vpop.eup %3126 }
0x101b   :  { %v3129_v13 = vpop.eup %3128  ;;  %v1278_v40 = vmul.f32 %v3127_v10, %v3679_v35 }
0x101c   :  { %v1379_v25 = vmul.f32 %v3129_v13, %v3683_v38 }
0x107b   :  { %v1281_v11 = vpop.permute.xlu1 %1280 }
0x107c   :  { %v1283_v12 = vmul.f32 %v3127_v10, %v1281_v11 }
0x107e   :  { %1285 = vrot.lane.b32.xlu1 %v1283_v12, %s3209_s19 }
0x107f   :  { %v1382_v14 = vpop.permute.xlu0 %1381 }
0x1080   :  { %v1384_v17 = vmul.f32 %v3129_v13, %v1382_v14 }
0x1082   :  { %1386 = vrot.lane.b32.xlu0 %v1384_v17, %s3209_s19 }
0x10f0   :  { %v1286_v20 = vpop.permute.xlu1 %1285 }
0x10f1   :  { %v3726_v21 = vadd.f32 %v1286_v20, %v1278_v40 }
0x10f3   :  { %3130 = vtanh.f32 %v3726_v21 }
0x10f4   :  { %v1387_v27 = vpop.permute.xlu0 %1386 }
0x10f5   :  { %v3730_v5 = vadd.f32 %v1387_v27, %v1379_v25 }
0x10f7   :  { %3132 = vtanh.f32 %v3730_v5 }
0x10fd   :  { %v3131_v29 = vpop.eup %3130 }
0x10fe   :  { %1291 = vrot.lane.b32.xlu1 %v3131_v29, %s3209_s19 }
0x1101   :  { %v3133_v30 = vpop.eup %3132 }
0x1102   :  { %1392 = vrot.lane.b32.xlu0 %v3133_v30, %s3209_s19 }
0x1170   :  { %v1292_v31 = vpop.permute.xlu1 %1291 }
0x1171   :  { %v3735_v32 = vmul.f32 %v3127_v10, %v1292_v31 }
0x1173   :  { %1401 = vrot.lane.b32.xlu0 %v3735_v32, %s3214_s22 }
0x1174   :  { %v1393_v33 = vpop.permute.xlu0 %1392 }
0x1175   :  { %v1395_v34 = vmul.f32 %v3129_v13, %v1393_v33 }
0x1177   :  { %1397 = vrot.lane.b32.xlu1 %v1395_v34, %s3213_s21 }
0x117b   :  { %1502 = vrot.lane.b32.xlu1 %v1395_v34, %s3214_s22 }
0x11e5   :  { %v1402_v35 = vpop.permute.xlu0 %1401 }
0x11e9   :  { %v1398_v36 = vpop.permute.xlu1 %1397 }
0x11ea   :  { %v1404_v37 = vsel %vm241_vm3, %v1398_v36, %v1402_v35 }
0x11eb   :  { %2702 = vmatmul.mubr.msk.f32.vlgmr.msra.gmra.mrb[12].mxu1 %vm249_vm4, %v1404_v37 }
0x11ec   :  { %2990 = vmatpush3.bf16.msra.mxu1 %v3440_v16  ;;  %2739 = vmatprep.mubr.msk.f32.mxu1 %vm3211_vm2, %v3212_v46 }
0x11ed   :  { %v1503_v38 = vpop.permute.xlu1 %1502  ;;  %2991 = vmatprep.subr.bf16.mxu1 %v3208_v15 }
0x11ee   :  { %v1505_v39 = vsel %vm241_vm3, %v3521_v47, %v1503_v38 }
0x11ef   :  { %2721 = vmatmul.mubr.msk.f32.vlgmr.msra.gmra.mrb[18].mxu0 %vm249_vm4, %v1505_v39 }
0x11f0   :  { %2993 = vmatpush3.bf16.msra.mxu1 %v3447_v19  ;;  %3002 = vmatpush3.bf16.msra.mxu0 %v3311_v18 }
0x11f1   :  { %2994 = vmatprep.subr.bf16.mxu1 %v3208_v15  ;;  %3003 = vmatprep.subr.bf16.mxu0 %v3208_v15 }
0x11f2   :  { %2758 = vmatprep.mubr.msk.f32.mxu0 %vm3211_vm2, %v3212_v46 }
0x11f4   :  { %2996 = vmatpush3.bf16.msra.mxu1 %v3457_v22  ;;  %3005 = vmatpush3.bf16.msra.mxu0 %v3323_v23 }
0x11f5   :  { %2997 = vmatprep.subr.bf16.mxu1 %v3208_v15  ;;  %3006 = vmatprep.subr.bf16.mxu0 %v3208_v15 }
0x11f8   :  { %2999 = vmatpush3.bf16.msra.mxu1 %v3467_v26  ;;  %3008 = vmatpush3.bf16.msra.mxu0 %v3336_v28 }
0x11f9   :  { %3009 = vmatprep.subr.bf16.mxu0 %v3208_v15  ;;  %3012 = vmatprep.subr.bf16.mxu1 %v3208_v15 }
0x11fc   :  { %3011 = vmatpush3.bf16.msra.mxu0 %v3378_v45 }
0x12be   :  { %v1474_v18 = vpop.f32.mrb[12].mxu1 }
0x12bf   :  { %v1475_v47 = vadd.f32 %v3526_v48, %v1474_v18  ;;  %v2703_v41 = vpop.f32.mrb[13].mxu1 }
0x12c1   :  { %3134 = vtanh.f32 %v1475_v47  ;;  %v2232_v54 = vmul.f32 -1.442695, %v1475_v47 }
0x12c2   :  { %v1575_v23 = vpop.f32.mrb[18].mxu0 }
0x12c3   :  { %v1576_v49 = vadd.f32 %v3399_v52, %v1575_v23  ;;  %v2722_v51 = vpop.f32.mrb[19].mxu0 }
0x12c5   :  { %3136 = vtanh.f32 %v1576_v49  ;;  %v2234_v55 = vmul.f32 -1.442695, %v1576_v49 }
0x12c6   :  { %3138 = vpow2.f32 %v2232_v54 }
0x12c7   :  { %3140 = vpow2.f32 %v2234_v55 }
0x12cb   :  { %v3135_v53 = vpop.eup %3134 }
0x12cc   :  { %1487 = vrot.lane.b32.xlu0 %v3135_v53, %s3209_s19 }
0x12cf   :  { %v3137_v28 = vpop.eup %3136 }
0x12d0   :  { %1588 = vrot.lane.b32.xlu1 %v3137_v28, %s3209_s19  ;;  %v3139_v45 = vpop.eup %3138 }
0x12d1   :  { %v1481_v56 = vadd.f32 1.0, %v3139_v45  ;;  %v3141_v57 = vpop.eup %3140 }
0x12d2   :  { %v1582_v58 = vadd.f32 1.0, %v3141_v57 }
0x12d3   :  { %3142 = vrcp.f32 %v1481_v56 }
0x12d4   :  { %3144 = vrcp.f32 %v1582_v58 }
0x12dd   :  { %v3143_v42 = vpop.eup %3142 }
0x12de   :  { %v3145_v60 = vpop.eup %3144  ;;  %v1485_v0 = vmul.f32 %v3143_v42, %v3726_v21 }
0x12df   :  { %v1586_v3 = vmul.f32 %v3145_v60, %v3730_v5 }
0x133e   :  { %v1488_v52 = vpop.permute.xlu0 %1487 }
0x133f   :  { %v1490_v59 = vmul.f32 %v3143_v42, %v1488_v52 }
0x1341   :  { %1492 = vrot.lane.b32.xlu0 %v1490_v59, %s3209_s19 }
0x1342   :  { %v1589_v62 = vpop.permute.xlu1 %1588 }
0x1343   :  { %v1591_v63 = vmul.f32 %v3145_v60, %v1589_v62 }
0x1345   :  { %1593 = vrot.lane.b32.xlu1 %v1591_v63, %s3209_s19 }
0x13b3   :  { %v1493_v1 = vpop.permute.xlu0 %1492 }
0x13b4   :  { %v3772_v2 = vadd.f32 %v1493_v1, %v1485_v0 }
0x13b6   :  { %3146 = vtanh.f32 %v3772_v2 }
0x13b7   :  { %v1594_v4 = vpop.permute.xlu1 %1593 }
0x13b8   :  { %v3776_v43 = vadd.f32 %v1594_v4, %v1586_v3  ;;  %v1935_v3 = vld [vmem:[%s3935_s6 + $0x8] sm:$0xff] }
0x13ba   :  { %3148 = vtanh.f32 %v3776_v43 }
0x13c0   :  { %v3147_v6 = vpop.eup %3146 }
0x13c1   :  { %1498 = vrot.lane.b32.xlu0 %v3147_v6, %s3209_s19 }
0x13c4   :  { %v3149_v7 = vpop.eup %3148 }
0x13c5   :  { %1599 = vrot.lane.b32.xlu1 %v3149_v7, %s3209_s19 }
0x1433   :  { %v1499_v9 = vpop.permute.xlu0 %1498 }
0x1434   :  { %v3781_v10 = vmul.f32 %v3143_v42, %v1499_v9 }
0x1436   :  { %1608 = vrot.lane.b32.xlu1 %v3781_v10, %s3214_s22 }
0x1437   :  { %v1600_v11 = vpop.permute.xlu1 %1599 }
0x1438   :  { %v1602_v12 = vmul.f32 %v3145_v60, %v1600_v11 }
0x143a   :  { %1604 = vrot.lane.b32.xlu0 %v1602_v12, %s3213_s21 }
0x143e   :  { %1709 = vrot.lane.b32.xlu0 %v1602_v12, %s3214_s22 }
0x14a8   :  { %v1609_v13 = vpop.permute.xlu1 %1608 }
0x14ac   :  { %v1605_v14 = vpop.permute.xlu0 %1604 }
0x14ad   :  { %v1611_v17 = vsel %vm241_vm3, %v1605_v14, %v1609_v13 }
0x14ae   :  { %2740 = vmatmul.mubr.msk.f32.vlgmr.msra.gmra.mrb[14].mxu1 %vm249_vm4, %v1611_v17 }
0x14af   :  { %3014 = vmatpush3.bf16.msra.mxu1 %v3440_v16  ;;  %2777 = vmatprep.mubr.msk.f32.mxu1 %vm3211_vm2, %v3212_v46 }
0x14b0   :  { %v1710_v40 = vpop.permute.xlu0 %1709  ;;  %3015 = vmatprep.subr.bf16.mxu1 %v3208_v15 }
0x14b1   :  { %v1712_v20 = vsel %vm241_vm3, %v3519_v44, %v1710_v40  ;;  %v3206_v44 = vld [vmem:[%s3933_s3] ss:$0 sm:$0xff] }
0x14b2   :  { %2759 = vmatmul.mubr.msk.f32.vlgmr.msra.gmra.mrb[20].mxu0 %vm249_vm4, %v1712_v20 }
0x14b3   :  { %3017 = vmatpush3.bf16.msra.mxu1 %v3447_v19 }
0x14b4   :  { %3018 = vmatprep.subr.bf16.mxu1 %v3208_v15 }
0x14b7   :  { %3020 = vmatpush3.bf16.msra.mxu1 %v3457_v22 }
0x14b8   :  { %3021 = vmatprep.subr.bf16.mxu1 %v3208_v15 }
0x14bb   :  { %3023 = vmatpush3.bf16.msra.mxu1 %v3467_v26 }
0x1581   :  { %v1681_v16 = vpop.f32.mrb[14].mxu1 }
0x1582   :  { %v1682_v46 = vadd.f32 %v3526_v48, %v1681_v16  ;;  %v2741_v21 = vpop.f32.mrb[15].mxu1 }
0x1584   :  { %3150 = vtanh.f32 %v1682_v46  ;;  %v2236_v15 = vmul.f32 -1.442695, %v1682_v46 }
0x1585   :  { %v1782_v25 = vpop.f32.mrb[20].mxu0 }
0x1586   :  { %v1783_v27 = vadd.f32 %v3206_v44, %v1782_v25  ;;  %v2760_v19 = vpop.f32.mrb[21].mxu0 }
0x1588   :  { %3152 = vtanh.f32 %v1783_v27  ;;  %v2238_v26 = vmul.f32 -1.442695, %v1783_v27 }
0x1589   :  { %3154 = vpow2.f32 %v2236_v15 }
0x158a   :  { %3156 = vpow2.f32 %v2238_v26 }
0x158e   :  { %v3151_v5 = vpop.eup %3150 }
0x158f   :  { %1694 = vrot.lane.b32.xlu1 %v3151_v5, %s3209_s19 }
0x1592   :  { %v3153_v22 = vpop.eup %3152 }
0x1593   :  { %1795 = vrot.lane.b32.xlu0 %v3153_v22, %s3209_s19  ;;  %v3155_v29 = vpop.eup %3154 }
0x1594   :  { %v1688_v30 = vadd.f32 1.0, %v3155_v29  ;;  %v3157_v31 = vpop.eup %3156 }
0x1595   :  { %v1789_v33 = vadd.f32 1.0, %v3157_v31 }
0x1596   :  { %3158 = vrcp.f32 %v1688_v30 }
0x1597   :  { %3160 = vrcp.f32 %v1789_v33 }
0x15a0   :  { %v3159_v34 = vpop.eup %3158 }
0x15a1   :  { %v3161_v37 = vpop.eup %3160  ;;  %v1692_v18 = vmul.f32 %v3159_v34, %v3772_v2  ;;  %v1934_v2 = vld [vmem:[%s3935_s6] sm:$0xff] }
0x15a2   :  { %v1793_v23 = vmul.f32 %v3161_v37, %v3776_v43  ;;  %v3024_v4 = vpack.c.bf16 %v1935_v3, %v1934_v2  ;;  %v1937_v43 = vld [vmem:[%s3935_s6 + $0x18] sm:$0xff] }
0x15a4   :  { %3025 = vmatprep.subr.bf16.mxu0 %v3024_v4  ;;  %3032 = vmatprep.subr.bf16.mxu1 %v3024_v4 }
0x15a5   :  { %3027 = vmatpush3.bf16.msra.mxu0 %v3024_v4 }
0x1601   :  { %v1695_v35 = vpop.permute.xlu1 %1694 }
0x1602   :  { %v1697_v36 = vmul.f32 %v3159_v34, %v1695_v35 }
0x1604   :  { %1699 = vrot.lane.b32.xlu1 %v1697_v36, %s3209_s19 }
0x1605   :  { %v1796_v38 = vpop.permute.xlu0 %1795 }
0x1606   :  { %v1798_v39 = vmul.f32 %v3161_v37, %v1796_v38 }
0x1608   :  { %1800 = vrot.lane.b32.xlu0 %v1798_v39, %s3209_s19 }
0x1676   :  { %v1700_v47 = vpop.permute.xlu1 %1699 }
0x1677   :  { %v1702_v41 = vadd.f32 %v1700_v47, %v1692_v18 }
0x1679   :  { %3162 = vtanh.f32 %v1702_v41 }
0x167a   :  { %v1801_v49 = vpop.permute.xlu0 %1800 }
0x167b   :  { %v3811_v51 = vadd.f32 %v1801_v49, %v1793_v23 }
0x167d   :  { %3164 = vtanh.f32 %v3811_v51 }
0x1683   :  { %v3163_v53 = vpop.eup %3162 }
0x1684   :  { %1705 = vrot.lane.b32.xlu1 %v3163_v53, %s3209_s19 }
0x1687   :  { %v3165_v28 = vpop.eup %3164 }
0x1688   :  { %1806 = vrot.lane.b32.xlu0 %v3165_v28, %s3209_s19 }
0x16f6   :  { %v1706_v54 = vpop.permute.xlu1 %1705 }
0x16f7   :  { %v1708_v55 = vmul.f32 %v3159_v34, %v1706_v54 }
0x16f9   :  { %1815 = vrot.lane.b32.xlu0 %v1708_v55, %s3214_s22 }
0x16fa   :  { %v1807_v45 = vpop.permute.xlu0 %1806 }
0x16fb   :  { %v1809_v56 = vmul.f32 %v3161_v37, %v1807_v45 }
0x16fd   :  { %1811 = vrot.lane.b32.xlu1 %v1809_v56, %s3213_s21 }
0x176b   :  { %v1816_v57 = vpop.permute.xlu0 %1815 }
0x176f   :  { %v1812_v58 = vpop.permute.xlu1 %1811 }
0x1770   :  { %v1818_v42 = vsel %vm241_vm3, %v1812_v58, %v1816_v57  ;;  %1916 = vst.msk [vmem:[%s3934_s9] sm:$0xff] %vm241_vm3, %v1812_v58 }
0x1771   :  { %2778 = vmatmul.mubr.msk.f32.vlgmr.msra.gmra.mrb[16].mxu1 %vm249_vm4, %v1818_v42 }
0x1772   :  { %3034 = vmatpush3.bf16.msra.mxu1 %v3024_v4 }
0x1844   :  { %v1888_v52 = vpop.f32.mrb[16].mxu1 }
0x1845   :  { %v1889_v59 = vadd.f32 %v3526_v48, %v1888_v52  ;;  %v2779_v60 = vpop.f32.mrb[17].mxu1  ;;  %v1936_v48 = vld [vmem:[%s3935_s6 + $0x10] sm:$0xff] }
0x1846   :  { %v3028_v6 = vpack.c.bf16 %v1937_v43, %v1936_v48 }
0x1847   :  { %3166 = vtanh.f32 %v1889_v59  ;;  %v2240_v63 = vmul.f32 -1.442695, %v1889_v59 }
0x1848   :  { %3029 = vmatprep.subr.bf16.mxu0 %v3028_v6  ;;  %3033 = vmatprep.subr.bf16.mxu1 %v3028_v6 }
0x1849   :  { %3168 = vpow2.f32 %v2240_v63  ;;  %3031 = vmatpush3.bf16.msra.mxu0 %v3028_v6  ;;  %3035 = vmatpush3.bf16.msra.mxu1 %v3028_v6 }
0x1851   :  { %v3167_v62 = vpop.eup %3166 }
0x1852   :  { %1901 = vrot.lane.b32.xlu1 %v3167_v62, %s3209_s19 }
0x1853   :  { %v3169_v0 = vpop.eup %3168 }
0x1854   :  { %v1895_v1 = vadd.f32 1.0, %v3169_v0 }
0x1856   :  { %3170 = vrcp.f32 %v1895_v1 }
0x1860   :  { %v3171_v7 = vpop.eup %3170 }
0x1861   :  { %v1899_v12 = vmul.f32 %v3171_v7, %v1702_v41 }
0x18c4   :  { %v1902_v9 = vpop.permute.xlu1 %1901 }
0x18c5   :  { %v1904_v11 = vmul.f32 %v3171_v7, %v1902_v9 }
0x18c7   :  { %1906 = vrot.lane.b32.xlu0 %v1904_v11, %s3209_s19 }
0x18cb   :  { %1945 = vrot.lane.b32.xlu0 %v3547_v24, %s3213_s21 }
0x18cf   :  { %1947 = vrot.lane.b32.xlu0 %v3594_v8, %s3213_s21 }
0x18d3   :  { %1949 = vrot.lane.b32.xlu0 %v3641_v61, %s3213_s21 }
0x1939   :  { %v1907_v13 = vpop.permute.xlu0 %1906 }
0x193a   :  { %v3845_v14 = vadd.f32 %v1907_v13, %v1899_v12 }
0x193c   :  { %3172 = vtanh.f32 %v3845_v14 }
0x193d   :  { %v1946_v17 = vpop.permute.xlu0 %1945 }
0x193e   :  { %2788 = vmatprep.mubr.msk.f32.mxu0 %vm241_vm3, %v1946_v17 }
0x1941   :  { %v1948_v40 = vpop.permute.xlu0 %1947 }
0x1942   :  { %2789 = vmatmul.mubr.msk.f32.vlgmr.msra.gmra.mrb[22].mxu0 %vm241_vm3, %v1948_v40 }
0x1945   :  { %v1950_v20 = vpop.permute.xlu0 %1949 }
0x1946   :  { %v3173_v24 = vpop.eup %3172  ;;  %2791 = vmatprep.mubr.msk.f32.mxu0 %vm241_vm3, %v1950_v20 }
0x1947   :  { %1912 = vrot.lane.b32.xlu1 %v3173_v24, %s3209_s19 }
0x194b   :  { %1953 = vrot.lane.b32.xlu1 %v3735_v32, %s3213_s21 }
0x194f   :  { %1955 = vrot.lane.b32.xlu1 %v3781_v10, %s3213_s21 }
0x1953   :  { %1957 = vrot.lane.b32.xlu1 %v1708_v55, %s3213_s21 }
0x1957   :  { %1951 = vrot.lane.b32.xlu1 %v3688_v50, %s3213_s21  ;;  %v2243_v50 = vld [vmem:[%s3936_s7] ss:$0 sm:$0xff] }
0x19b9   :  { %v1913_v8 = vpop.permute.xlu1 %1912 }
0x19ba   :  { %v1915_v61 = vmul.f32 %v3171_v7, %v1913_v8 }
0x19bc   :  { %1923 = vrot.lane.b32.xlu0 %v1915_v61, %s3213_s21 }
0x19bd   :  { %v1954_v16 = vpop.permute.xlu1 %1953 }
0x19be   :  { %2794 = vmatprep.mubr.msk.f32.mxu1 %vm241_vm3, %v1954_v16 }
0x19c1   :  { %v1956_v46 = vpop.permute.xlu1 %1955 }
0x19c2   :  { %2795 = vmatmul.mubr.msk.f32.vlgmr.msra.gmra.mrb[18].mxu1 %vm241_vm3, %v1956_v46 }
0x19c5   :  { %v1958_v21 = vpop.permute.xlu1 %1957 }
0x19c6   :  { %2797 = vmatprep.mubr.msk.f32.mxu1 %vm241_vm3, %v1958_v21 }
0x19c9   :  { %v1952_v32 = vpop.permute.xlu1 %1951 }
0x19ca   :  { %2792 = vmatmul.mubr.msk.f32.gmra.mrb[24].mxu0 %vm241_vm3, %v1952_v32 }
0x1a15   :  { %v2790_v10 = vpop.f32.mrb[22].mxu0 }
0x1a16   :  { %v2047_v25 = vadd.f32 %v2790_v10, %v2243_v50  ;;  %v2041_v44 = vpop.f32.mrb[23].mxu0 }
0x1a17   :  { %v2042_v27 = vadd.f32 %v2243_v50, %v2041_v44 }
0x1a18   :  { %2082 = vmax.xlane.f32.xlu1 %v2047_v25 }
0x1a19   :  { %2080 = vmax.xlane.f32.xlu0 %v2042_v27 }
0x1a2e   :  { %v1924_v19 = vpop.permute.xlu0 %1923 }
0x1a2f   :  { %2241 = vst.msk [vmem:[%s3934_s9 + $0x8] sm:$0xff] %vm241_vm3, %v1924_v19  ;;  %2798 = vmatmul.mubr.msk.f32.gmra.mrb[20].mxu1 %vm241_vm3, %v1924_v19 }
0x1a95   :  { %v2796_v5 = vpop.f32.mrb[18].mxu1 }
0x1a96   :  { %v2061_v22 = vpop.f32.mrb[19].mxu1  ;;  %v2067_v33 = vadd.f32 %v2796_v5, %v2243_v50 }
0x1a97   :  { %v2062_v15 = vadd.f32 %v2243_v50, %v2061_v22 }
0x1a99   :  { %2088 = vmax.xlane.f32.xlu1 %v2062_v15 }
0x1a9d   :  { %v2793_v26 = vpop.f32.mrb[24].mxu0 }
0x1a9e   :  { %v2051_v29 = vpop.f32.mrb[25].mxu0  ;;  %v2057_v31 = vadd.f32 %v2793_v26, %v2243_v50 }
0x1a9f   :  { %v2052_v30 = vadd.f32 %v2243_v50, %v2051_v29 }
0x1aa1   :  { %2084 = vmax.xlane.f32.xlu0 %v2052_v30 }
0x1aa5   :  { %2086 = vmax.xlane.f32.xlu0 %v2057_v31  ;;  %v2083_v34 = vpop.xlane.xlu1 %2082 }
0x1aa6   :  { %v2081_v35 = vpop.xlane.xlu0 %2080  ;;  %v3872_v36 = vsub.f32 %v2047_v25, %v2083_v34 }
0x1aa7   :  { %v3874_v37 = vsub.f32 %v2042_v27, %v2081_v35 }
0x1aa8   :  { %v2106_v38 = vmul.f32 1.442695, %v3872_v36 }
0x1aa9   :  { %2090 = vmax.xlane.f32.xlu0 %v2067_v33  ;;  %v2104_v39 = vmul.f32 1.442695, %v3874_v37 }
0x1aaa   :  { %3174 = vpow2.f32 %v2106_v38 }
0x1aab   :  { %3176 = vpow2.f32 %v2104_v39 }
0x1ab4   :  { %v3175_v49 = vpop.eup %3174 }
0x1ab5   :  { %v3177_v53 = vpop.eup %3176 }
0x1b02   :  { %v2799_v18 = vpop.f32.mrb[20].mxu1 }
0x1b03   :  { %v2077_v47 = vadd.f32 %v2799_v18, %v2243_v50  ;;  %v2071_v41 = vpop.f32.mrb[21].mxu1 }
0x1b04   :  { %v2072_v23 = vadd.f32 %v2243_v50, %v2071_v41 }
0x1b05   :  { %2094 = vmax.xlane.f32.xlu0 %v2077_v47 }
0x1b06   :  { %2092 = vmax.xlane.f32.xlu1 %v2072_v23 }
0x1b09   :  { %2122 = vadd.xlane.f32.xlu0 %v3175_v49 }
0x1b0a   :  { %2120 = vadd.xlane.f32.xlu1 %v3177_v53 }
0x1b26   :  { %v2089_v28 = vpop.xlane.xlu1 %2088 }
0x1b27   :  { %v3878_v54 = vsub.f32 %v2062_v15, %v2089_v28 }
0x1b29   :  { %v2112_v57 = vmul.f32 1.442695, %v3878_v54 }
0x1b2e   :  { %v2085_v55 = vpop.xlane.xlu0 %2084 }
0x1b2f   :  { %v2098_v45 = vsub.f32 %v2052_v30, %v2085_v55 }
0x1b31   :  { %v2108_v56 = vmul.f32 1.442695, %v2098_v45 }
0x1b32   :  { %v2087_v58 = vpop.xlane.xlu0 %2086 }
0x1b33   :  { %3178 = vpow2.f32 %v2108_v56  ;;  %v2099_v42 = vsub.f32 %v2057_v31, %v2087_v58 }
0x1b34   :  { %3180 = vpow2.f32 %v2112_v57 }
0x1b35   :  { %v2110_v52 = vmul.f32 1.442695, %v2099_v42 }
0x1b36   :  { %v2091_v59 = vpop.xlane.xlu0 %2090 }
0x1b37   :  { %3182 = vpow2.f32 %v2110_v52  ;;  %v2101_v60 = vsub.f32 %v2067_v33, %v2091_v59 }
0x1b39   :  { %v2114_v62 = vmul.f32 1.442695, %v2101_v60 }
0x1b3b   :  { %3184 = vpow2.f32 %v2114_v62 }
0x1b3d   :  { %v3179_v63 = vpop.eup %3178 }
0x1b3e   :  { %2124 = vadd.xlane.f32.xlu1 %v3179_v63  ;;  %v3181_v0 = vpop.eup %3180 }
0x1b41   :  { %v3183_v1 = vpop.eup %3182 }
0x1b42   :  { %2126 = vadd.xlane.f32.xlu0 %v3183_v1  ;;  %2128 = vadd.xlane.f32.xlu1 %v3181_v0 }
0x1b45   :  { %v3185_v2 = vpop.eup %3184 }
0x1b46   :  { %2130 = vadd.xlane.f32.xlu0 %v3185_v2 }
0x1b92   :  { %v2095_v3 = vpop.xlane.xlu0 %2094 }
0x1b93   :  { %v3881_v4 = vsub.f32 %v2077_v47, %v2095_v3  ;;  %v2093_v48 = vpop.xlane.xlu1 %2092 }
0x1b94   :  { %v3883_v43 = vsub.f32 %v2072_v23, %v2093_v48 }
0x1b95   :  { %v2118_v6 = vmul.f32 1.442695, %v3881_v4 }
0x1b96   :  { %v2116_v7 = vmul.f32 1.442695, %v3883_v43  ;;  %v2123_v9 = vpop.xlane.xlu0 %2122 }
0x1b97   :  { %3186 = vpow2.f32 %v2118_v6  ;;  %v2121_v11 = vpop.xlane.xlu1 %2120 }
0x1b98   :  { %3188 = vpow2.f32 %v2116_v7 }
0x1b99   :  { %3190 = vlog2.f32 %v2123_v9 }
0x1b9a   :  { %3192 = vlog2.f32 %v2121_v11 }
0x1ba1   :  { %v3187_v12 = vpop.eup %3186 }
0x1ba2   :  { %v3189_v13 = vpop.eup %3188  ;;  %2134 = vadd.xlane.f32.xlu0 %v3187_v12 }
0x1ba3   :  { %v3191_v17 = vpop.eup %3190  ;;  %2132 = vadd.xlane.f32.xlu1 %v3189_v13 }
0x1ba4   :  { %v3193_v40 = vpop.eup %3192  ;;  %v2139_v20 = vmul.f32 0.6931472, %v3191_v17 }
0x1ba5   :  { %v2137_v24 = vmul.f32 0.6931472, %v3193_v40 }
0x1ba6   :  { %v2153_v8 = vsub.f32 %v3872_v36, %v2139_v20 }
0x1ba7   :  { %v2152_v61 = vsub.f32 %v3874_v37, %v2137_v24 }
0x1ba8   :  { %2161 = vst [vmem:[%s3937_s8 + $0x8] sm:$0xff] %v2153_v8 }
0x1ba9   :  { %2160 = vst [vmem:[%s3937_s8] sm:$0xff] %v2152_v61 }
0x1bb4   :  { %1918 = vrot.lane.b32.xlu1 %v3811_v51, %s3214_s22 }
0x1bb8   :  { %1929 = vrot.lane.b32.xlu0 %v3845_v14, %s3214_s22 }
0x1bcb   :  { %v2125_v16 = vpop.xlane.xlu1 %2124 }
0x1bcc   :  { %3194 = vlog2.f32 %v2125_v16 }
0x1bcf   :  { %v2127_v46 = vpop.xlane.xlu0 %2126  ;;  %v2129_v21 = vpop.xlane.xlu1 %2128 }
0x1bd0   :  { %3196 = vlog2.f32 %v2127_v46 }
0x1bd1   :  { %3198 = vlog2.f32 %v2129_v21 }
0x1bd3   :  { %v2131_v32 = vpop.xlane.xlu0 %2130 }
0x1bd4   :  { %3200 = vlog2.f32 %v2131_v32 }
0x1bd6   :  { %v3195_v50 = vpop.eup %3194 }
0x1bd7   :  { %v2141_v10 = vmul.f32 0.6931472, %v3195_v50 }
0x1bd9   :  { %v2154_v25 = vsub.f32 %v2098_v45, %v2141_v10 }
0x1bda   :  { %v3197_v44 = vpop.eup %3196 }
0x1bdb   :  { %v3199_v27 = vpop.eup %3198  ;;  %2162 = vst [vmem:[%s3937_s8 + $0x10] sm:$0xff] %v2154_v25  ;;  %v2143_v51 = vmul.f32 0.6931472, %v3197_v44 }
0x1bdc   :  { %v2145_v19 = vmul.f32 0.6931472, %v3199_v27 }
0x1bdd   :  { %v2155_v14 = vsub.f32 %v2099_v42, %v2143_v51 }
0x1bde   :  { %v3201_v5 = vpop.eup %3200  ;;  %v2156_v22 = vsub.f32 %v3878_v54, %v2145_v19 }
0x1bdf   :  { %2163 = vst [vmem:[%s3937_s8 + $0x18] sm:$0xff] %v2155_v14  ;;  %v2147_v15 = vmul.f32 0.6931472, %v3201_v5 }
0x1be0   :  { %2164 = vst [vmem:[%s3937_s8 + $0x20] sm:$0xff] %v2156_v22 }
0x1be1   :  { %v2157_v26 = vsub.f32 %v2101_v60, %v2147_v15 }
0x1be3   :  { %2165 = vst [vmem:[%s3937_s8 + $0x28] sm:$0xff] %v2157_v26 }
0x1c2f   :  { %v2135_v29 = vpop.xlane.xlu0 %2134 }
0x1c30   :  { %3202 = vlog2.f32 %v2135_v29  ;;  %v2133_v30 = vpop.xlane.xlu1 %2132 }
0x1c31   :  { %3204 = vlog2.f32 %v2133_v30 }
0x1c33   :  { %v1930_v31 = vpop.permute.xlu0 %1929 }
0x1c34   :  { %2242 = vst.msk [vmem:[%s3938_s10 + $0x8] sm:$0xff] %vm241_vm3, %v1930_v31  ;;  %v1919_v33 = vpop.permute.xlu1 %1918 }
0x1c35   :  { %1921 = vst.msk [vmem:[%s3938_s10] sm:$0xff] %vm241_vm3, %v1919_v33 }
0x1c3a   :  { %v3203_v34 = vpop.eup %3202 }
0x1c3b   :  { %v3205_v35 = vpop.eup %3204  ;;  %v2151_v36 = vmul.f32 0.6931472, %v3203_v34 }
0x1c3c   :  { %v2149_v37 = vmul.f32 0.6931472, %v3205_v35 }
0x1c3d   :  { %v2159_v38 = vsub.f32 %v3881_v4, %v2151_v36 }
0x1c3e   :  { %v2158_v39 = vsub.f32 %v3883_v43, %v2149_v37 }
0x1c3f   :  { %2167 = vst [vmem:[%s3937_s8 + $0x38] sm:$0xff] %v2159_v38 }
0x1c40   :  { %2166 = vst [vmem:[%s3937_s8 + $0x30] sm:$0xff] %v2158_v39 }

</bundles_post_ra>
